<compile_context>
chip_gen: v5e
topology: v5e:2x2
jax: 0.10.0
libtpu: 0.0.40
codegen_flags: <defaults>
</compile_context>

<pallas_src>
import functools

import jax
import jax.numpy as jnp
from jax.experimental import pallas as pl
from jax.experimental.pallas import tpu as pltpu


def _round_up(a: int, b: int) -> int:
    return (a + b - 1) // b * b


def _ddp_mlp_kernel(x_ref, w1_ref, b1_ref, w2_ref, b2_ref, o_ref):
    # x_ref : (tm, H)   bf16   (streamed per grid step)
    # w1_ref: (H, 4H)   bf16   (resident: constant index_map)
    # b1_ref: (1, 4H)   f32
    # w2_ref: (4H, H)   bf16   (resident)
    # b2_ref: (1, H)    f32
    # o_ref : (tm, H)   f32
    x = x_ref[...]
    # MXU matmul in bf16, accumulate in f32.
    h = jnp.dot(x, w1_ref[...], preferred_element_type=jnp.float32)
    h = h + b1_ref[...]                       # f32 bias add (VPU)
    # GPT-2 "gelu_new" == tanh-approximate gelu; keep it in f32 (v5e-safe).
    h = jax.nn.gelu(h, approximate=True)
    # Cast back to bf16 only at the MXU input of the second matmul.
    y = jnp.dot(h.astype(w2_ref.dtype), w2_ref[...],
                preferred_element_type=jnp.float32)
    y = y + b2_ref[...]
    o_ref[...] = y.astype(o_ref.dtype)


@functools.partial(jax.jit, static_argnames=("tm",))
def ddp_mlp_forward(x, w1, b1, w2, b2, *, tm: int = 256):
    """x: [B, S, H] float32 -> [B, S, H] float32.

    w1: [H, 4H], b1: [1, 4H], w2: [4H, H], b2: [1, H]  (float32 params;
    weights are cast to bf16 for the MXU inside this wrapper).
    """
    B, S, H = x.shape
    H4 = w1.shape[1]
    # Lane-dense requirement: last dim of every block must be a multiple of 128.
    assert H % 128 == 0 and H4 % 128 == 0, "hidden dims must be multiples of 128"

    M = B * S
    # Don't use a tile larger than (M rounded to the sublane multiple).
    tm = min(tm, _round_up(M, 8))
    M_pad = _round_up(M, tm)

    x2d = x.reshape(M, H)
    if M_pad != M:
        x2d = jnp.pad(x2d, ((0, M_pad - M), (0, 0)))

    # bf16 MXU inputs (halves HBM traffic + resident-weight VMEM); f32 biases.
    x_bf = x2d.astype(jnp.bfloat16)
    w1_bf = w1.astype(jnp.bfloat16)
    w2_bf = w2.astype(jnp.bfloat16)
    b1_f32 = b1.astype(jnp.float32)
    b2_f32 = b2.astype(jnp.float32)

    grid = (M_pad // tm,)

    # VMEM budget: double-buffered weights + x/out tiles + biases + f32
    # intermediate h tile, with 2x headroom, capped safely below v7x's 64 MiB.
    bf16_b, f32_b = 2, 4
    vmem_est = (
        2 * (H * H4 + H4 * H) * bf16_b      # w1 + w2 (double-buffered)
        + 2 * tm * H * bf16_b               # x tiles (double-buffered)
        + 2 * tm * H * f32_b                # out tiles (double-buffered)
        + 2 * (H4 + H) * f32_b              # biases
        + tm * H4 * f32_b                   # f32 intermediate h
    )
    vmem_limit = int(min(max(2 * vmem_est, 8 << 20), 48 << 20))

    cost = pl.CostEstimate(
        flops=4 * M_pad * H * H4,           # two matmuls: 2*M*H*4H each
        transcendentals=M_pad * H4,         # tanh in gelu_new
        bytes_accessed=(M_pad * H * bf16_b          # x
                        + (H * H4 + H4 * H) * bf16_b  # weights
                        + (H4 + H) * f32_b            # biases
                        + M_pad * H * f32_b),         # out
    )

    out = pl.pallas_call(
        _ddp_mlp_kernel,
        out_shape=jax.ShapeDtypeStruct((M_pad, H), jnp.float32),
        grid=grid,
        in_specs=[
            pl.BlockSpec((tm, H), lambda i: (i, 0)),    # x: streamed row tiles
            pl.BlockSpec((H, H4), lambda i: (0, 0)),    # w1: resident
            pl.BlockSpec((1, H4), lambda i: (0, 0)),    # b1: resident
            pl.BlockSpec((H4, H), lambda i: (0, 0)),    # w2: resident
            pl.BlockSpec((1, H), lambda i: (0, 0)),     # b2: resident
        ],
        out_specs=pl.BlockSpec((tm, H), lambda i: (i, 0)),
        compiler_params=pltpu.CompilerParams(
            dimension_semantics=("parallel",),          # megacore-shardable
            vmem_limit_bytes=vmem_limit,
        ),
        cost_estimate=cost,
    )(x_bf, w1_bf, b1_f32, w2_bf, b2_f32)

    return out[:M].reshape(B, S, H)


class PallasGPT2MLP:
    """The wrapped `module` whose forward DDP delegates to."""

    def __init__(self, hidden, key):
        k1, k2, k3, k4 = jax.random.split(key, 4)
        h4 = 4 * hidden
        self.w1 = 0.02 * jax.random.normal(k1, (hidden, h4), jnp.float32)
        self.b1 = 0.02 * jax.random.normal(k2, (1, h4), jnp.float32)
        self.w2 = 0.02 * jax.random.normal(k3, (h4, hidden), jnp.float32)
        self.b2 = 0.02 * jax.random.normal(k4, (1, hidden), jnp.float32)

    def __call__(self, x):
        return ddp_mlp_forward(x, self.w1, self.b1, self.w2, self.b2)

    def parameters(self):
        return [self.w1, self.b1, self.w2, self.b2]


class DistributedDataParallel:
    """JAX analogue of the Megatron DDP wrapper.

    forward(): set needs_reduction flag and pass through to the module.
    """

    def __init__(self, module):
        self.module = module
        self.needs_reduction = False
        # TODO(synk): dist.broadcast of parameters at init and the gradient
        # all-reduce hook (allreduce_params) are multi-host, backward-time
        # collectives on grads; no forward-pass Pallas equivalent.

    def forward(self, *inputs, **kwargs):
        self.needs_reduction = True
        return self.module(*inputs, **kwargs)

    def __call__(self, *inputs, **kwargs):
        return self.forward(*inputs, **kwargs)

    def state_dict(self):
        return {"w1": self.module.w1, "b1": self.module.b1,
                "w2": self.module.w2, "b2": self.module.b2}


if __name__ == "__main__":
    key = jax.random.PRNGKey(0)
    k_param, k_x = jax.random.split(key)

    # Small but lane-dense shapes: H multiple of 128, 4H multiple of 128.
    B, S, H = 2, 64, 128
    module = PallasGPT2MLP(hidden=H, key=k_param)
    ddp = DistributedDataParallel(module)

    x = jax.random.normal(k_x, (B, S, H), jnp.float32)

    y = ddp(x)
    y = jax.block_until_ready(y)

    # Sanity check against plain-JAX f32 reference of the wrapped module.
    # Kernel runs bf16 MXU inputs with f32 accumulation, so loosen tolerance.
    ref = jax.nn.gelu(x.reshape(B * S, H) @ module.w1 + module.b1,
                      approximate=True) @ module.w2 + module.b2
    ref = ref.reshape(B, S, H)
    assert y.shape == (B, S, H)
    assert jnp.allclose(y, ref, atol=3e-2, rtol=3e-2), (
        float(jnp.max(jnp.abs(y - ref))))
    assert ddp.needs_reduction is True

    print("KERNEL_OK")
</pallas_src>

<mosaic_0001>
module attributes {stable_mosaic.version = 11 : i64} {
  func.func @_ddp_mlp_kernel(%arg0: i32, %arg1: memref<128x128xbf16, #tpu.memory_space<vmem>>, %arg2: memref<128x512xbf16, #tpu.memory_space<vmem>>, %arg3: memref<1x512xf32, #tpu.memory_space<vmem>>, %arg4: memref<512x128xbf16, #tpu.memory_space<vmem>>, %arg5: memref<1x128xf32, #tpu.memory_space<vmem>>, %arg6: memref<128x128xf32, #tpu.memory_space<vmem>>) attributes {dimension_semantics = [#tpu.dimension_semantics<parallel>], iteration_bounds = array<i64: 1>, scalar_prefetch = 0 : i64, scratch_operands = 0 : i64, tpu.core_type = #tpu.core_type<tc>, window_params = [{transform_indices = @transform_0, window_bounds = array<i64: 128, 128>}, {pipeline_mode = #tpu.pipeline_mode<synchronous>, transform_indices = @transform_1, window_bounds = array<i64: 128, 512>}, {pipeline_mode = #tpu.pipeline_mode<synchronous>, transform_indices = @transform_2, window_bounds = array<i64: 1, 512>}, {pipeline_mode = #tpu.pipeline_mode<synchronous>, transform_indices = @transform_3, window_bounds = array<i64: 512, 128>}, {pipeline_mode = #tpu.pipeline_mode<synchronous>, transform_indices = @transform_4, window_bounds = array<i64: 1, 128>}, {transform_indices = @transform_5, window_bounds = array<i64: 128, 128>}]} {
    %c0 = arith.constant 0 : index
    %c0_0 = arith.constant 0 : index
    %0 = vector.load %arg1[%c0, %c0_0] : memref<128x128xbf16, #tpu.memory_space<vmem>>, vector<128x128xbf16>
    %c0_1 = arith.constant 0 : index
    %c0_2 = arith.constant 0 : index
    %1 = vector.load %arg2[%c0_1, %c0_2] : memref<128x512xbf16, #tpu.memory_space<vmem>>, vector<128x512xbf16>
    %cst = arith.constant dense<0.000000e+00> : vector<128x512xf32>
    %2 = tpu.matmul %0, %1, %cst {dimension_numbers = #tpu.dot_dimension_numbers<[1], [0], [0], [1], [0, 0, 1, 1], [], []>} : vector<128x128xbf16>, vector<128x512xbf16>, vector<128x512xf32> -> vector<128x512xf32>
    %c0_3 = arith.constant 0 : index
    %c0_4 = arith.constant 0 : index
    %3 = vector.load %arg3[%c0_3, %c0_4] : memref<1x512xf32, #tpu.memory_space<vmem>>, vector<1x512xf32>
    %4 = vector.broadcast %3 : vector<1x512xf32> to vector<128x512xf32>
    %5 = arith.addf %2, %4 : vector<128x512xf32>
    %6 = arith.mulf %5, %5 : vector<128x512xf32>
    %7 = arith.mulf %5, %6 : vector<128x512xf32>
    %cst_5 = arith.constant 4.471500e-02 : f32
    %8 = vector.broadcast %cst_5 : f32 to vector<128x512xf32>
    %9 = arith.mulf %8, %7 : vector<128x512xf32>
    %10 = arith.addf %5, %9 : vector<128x512xf32>
    %cst_6 = arith.constant 0.797884583 : f32
    %11 = vector.broadcast %cst_6 : f32 to vector<128x512xf32>
    %12 = arith.mulf %11, %10 : vector<128x512xf32>
    %13 = math.tanh %12 : vector<128x512xf32>
    %cst_7 = arith.constant 1.000000e+00 : f32
    %14 = vector.broadcast %cst_7 : f32 to vector<128x512xf32>
    %15 = arith.addf %14, %13 : vector<128x512xf32>
    %cst_8 = arith.constant 5.000000e-01 : f32
    %16 = vector.broadcast %cst_8 : f32 to vector<128x512xf32>
    %17 = arith.mulf %16, %15 : vector<128x512xf32>
    %18 = arith.mulf %5, %17 : vector<128x512xf32>
    %19 = arith.truncf %18 : vector<128x512xf32> to vector<128x512xbf16>
    %c0_9 = arith.constant 0 : index
    %c0_10 = arith.constant 0 : index
    %20 = vector.load %arg4[%c0_9, %c0_10] : memref<512x128xbf16, #tpu.memory_space<vmem>>, vector<512x128xbf16>
    %cst_11 = arith.constant dense<0.000000e+00> : vector<128x128xf32>
    %21 = tpu.matmul %19, %20, %cst_11 {dimension_numbers = #tpu.dot_dimension_numbers<[1], [0], [0], [1], [0, 0, 1, 1], [], []>} : vector<128x512xbf16>, vector<512x128xbf16>, vector<128x128xf32> -> vector<128x128xf32>
    %c0_12 = arith.constant 0 : index
    %c0_13 = arith.constant 0 : index
    %22 = vector.load %arg5[%c0_12, %c0_13] : memref<1x128xf32, #tpu.memory_space<vmem>>, vector<1x128xf32>
    %23 = vector.broadcast %22 : vector<1x128xf32> to vector<128x128xf32>
    %24 = arith.addf %21, %23 : vector<128x128xf32>
    %c0_14 = arith.constant 0 : index
    %c0_15 = arith.constant 0 : index
    %25 = vector.load %arg6[%c0_14, %c0_15] : memref<128x128xf32, #tpu.memory_space<vmem>>, vector<128x128xf32>
    tpu.vector_store %arg6[%c0_14, %c0_15], %24 {strides = array<i32>} : memref<128x128xf32, #tpu.memory_space<vmem>>, vector<128x128xf32>,
    return
  }
  func.func @transform_0(%arg0: i32) -> (i32, i32) {
    %c0_i32 = arith.constant 0 : i32
    %c0_i32_0 = arith.constant 0 : i32
    return %arg0, %c0_i32 : i32, i32
  }
  func.func @transform_1(%arg0: i32) -> (i32, i32) {
    %c0_i32 = arith.constant 0 : i32
    %c0_i32_0 = arith.constant 0 : i32
    %c0_i32_1 = arith.constant 0 : i32
    return %c0_i32, %c0_i32_0 : i32, i32
  }
  func.func @transform_2(%arg0: i32) -> (i32, i32) {
    %c0_i32 = arith.constant 0 : i32
    %c0_i32_0 = arith.constant 0 : i32
    %c0_i32_1 = arith.constant 0 : i32
    return %c0_i32, %c0_i32_0 : i32, i32
  }
  func.func @transform_3(%arg0: i32) -> (i32, i32) {
    %c0_i32 = arith.constant 0 : i32
    %c0_i32_0 = arith.constant 0 : i32
    %c0_i32_1 = arith.constant 0 : i32
    return %c0_i32, %c0_i32_0 : i32, i32
  }
  func.func @transform_4(%arg0: i32) -> (i32, i32) {
    %c0_i32 = arith.constant 0 : i32
    %c0_i32_0 = arith.constant 0 : i32
    %c0_i32_1 = arith.constant 0 : i32
    return %c0_i32, %c0_i32_0 : i32, i32
  }
  func.func @transform_5(%arg0: i32) -> (i32, i32) {
    %c0_i32 = arith.constant 0 : i32
    %c0_i32_0 = arith.constant 0 : i32
    return %arg0, %c0_i32 : i32, i32
  }
}

</mosaic_0001>

<bundles_post_ra>
// kernel: ddp_mlp_forward.1
= control target key start
LH: loop header
LB: loop body
LE: loop exit
PB: predicated region body
PF: predicated region fallthrough
CT: control target
= control target key end

     0   :  { %s3114_s0 = inlined_call_operand.vmem [shape: bf16[128,128], index: 0, kind: input, shape index: {}]   ;;  %s3115_s1 = inlined_call_operand.vmem [shape: bf16[128,512], index: 1, kind: input, shape index: {}]   ;;  %s3116_s2 = inlined_call_operand.vmem [shape: f32[1,512], index: 2, kind: input, shape index: {}]   ;;  %s3117_s3 = inlined_call_operand.vmem [shape: bf16[512,128], index: 3, kind: input, shape index: {}]   ;;  %s3118_s4 = inlined_call_operand.vmem [shape: f32[1,128], index: 4, kind: input, shape index: {}]   ;;  %s3119_s5 = inlined_call_operand.hbm [shape: f32[128,128], index: 5, kind: output, shape index: {}]  }
   0x1   :  { %v1727_v0 = vld [vmem:[%s3115_s1 + $0xe0] sm:$0xf]  ;;  %v1907_v1 = vld [vmem:[%s3115_s1 + $0xec] sm:$0xf0]  ;;  %v1905_v2 = vld [vmem:[%s3115_s1 + $0xe4] sm:$0xf] }
   0x2   :  { %v1728_v3 = vor.u32 %v1907_v1, %v1727_v0  ;;  %v1729_v4 = vld [vmem:[%s3115_s1 + $0xf0] sm:$0xf0]  ;;  %v1735_v5 = vld [vmem:[%s3115_s1 + $0xe8] sm:$0xf]  ;;  %v1908_v6 = vld [vmem:[%s3115_s1 + $0xf4] sm:$0xf0] }
   0x3   :  { %v1732_v7 = vor.u32 %v1905_v2, %v1729_v4  ;;  %v1736_v8 = vor.u32 %v1908_v6, %v1735_v5  ;;  %v1906_v9 = vld [vmem:[%s3115_s1 + $0xec] sm:$0xf]  ;;  %v1737_v10 = vld [vmem:[%s3115_s1 + $0xf8] sm:$0xf0]  ;;  %v1711_v11 = vld [vmem:[%s3115_s1 + $0xc0] sm:$0xf] }
   0x4   :  { %287 = vmatpush.bf16.msra.mxu0 %v1728_v3  ;;  %v1740_v12 = vor.u32 %v1906_v9, %v1737_v10  ;;  %v1903_v13 = vld [vmem:[%s3115_s1 + $0xcc] sm:$0xf0]  ;;  %v1901_v14 = vld [vmem:[%s3115_s1 + $0xc4] sm:$0xf]  ;;  %v1713_v15 = vld [vmem:[%s3115_s1 + $0xd0] sm:$0xf0] }
   0x5   :  { %336 = vmatpush.bf16.msra.mxu1 %v1732_v7  ;;  %385 = vmatpush.bf16.msra.mxu2 %v1736_v8  ;;  %v1712_v16 = vor.u32 %v1903_v13, %v1711_v11  ;;  %v1716_v17 = vor.u32 %v1901_v14, %v1713_v15  ;;  %v1719_v18 = vld [vmem:[%s3115_s1 + $0xc8] sm:$0xf]  ;;  %v1904_v19 = vld [vmem:[%s3115_s1 + $0xd4] sm:$0xf0]  ;;  %v1902_v20 = vld [vmem:[%s3115_s1 + $0xcc] sm:$0xf] }
   0x6   :  { %434 = vmatpush.bf16.msra.mxu3 %v1740_v12  ;;  %v1720_v21 = vor.u32 %v1904_v19, %v1719_v18  ;;  %v1721_v22 = vld [vmem:[%s3115_s1 + $0xd8] sm:$0xf0]  ;;  %v1695_v23 = vld [vmem:[%s3115_s1 + $0xa0] sm:$0xf]  ;;  %v1899_v24 = vld [vmem:[%s3115_s1 + $0xac] sm:$0xf0] }
   0x7   :  { %v1724_v25 = vor.u32 %v1902_v20, %v1721_v22  ;;  %v1897_v26 = vld [vmem:[%s3115_s1 + $0xa4] sm:$0xf]  ;;  %v1697_v27 = vld [vmem:[%s3115_s1 + $0xb0] sm:$0xf0]  ;;  %v1703_v28 = vld [vmem:[%s3115_s1 + $0xa8] sm:$0xf]  ;;  %v1696_v29 = vor.u32 %v1899_v24, %v1695_v23 }
   0x8   :  { %288 = vmatpush.bf16.msra.mxu0 %v1712_v16  ;;  %v1900_v30 = vld [vmem:[%s3115_s1 + $0xb4] sm:$0xf0]  ;;  %v1898_v31 = vld [vmem:[%s3115_s1 + $0xac] sm:$0xf]  ;;  %v1705_v32 = vld [vmem:[%s3115_s1 + $0xb8] sm:$0xf0]  ;;  %v1700_v33 = vor.u32 %v1897_v26, %v1697_v27 }
   0x9   :  { %337 = vmatpush.bf16.msra.mxu1 %v1716_v17  ;;  %386 = vmatpush.bf16.msra.mxu2 %v1720_v21  ;;  %v1704_v34 = vor.u32 %v1900_v30, %v1703_v28  ;;  %v1679_v35 = vld [vmem:[%s3115_s1 + $0x80] sm:$0xf]  ;;  %v1895_v36 = vld [vmem:[%s3115_s1 + $0x8c] sm:$0xf0]  ;;  %v1893_v37 = vld [vmem:[%s3115_s1 + $0x84] sm:$0xf]  ;;  %v1708_v38 = vor.u32 %v1898_v31, %v1705_v32 }
   0xa   :  { %435 = vmatpush.bf16.msra.mxu3 %v1724_v25  ;;  %v1681_v39 = vld [vmem:[%s3115_s1 + $0x90] sm:$0xf0]  ;;  %v1687_v40 = vld [vmem:[%s3115_s1 + $0x88] sm:$0xf]  ;;  %v1896_v41 = vld [vmem:[%s3115_s1 + $0x94] sm:$0xf0]  ;;  %v1680_v44 = vor.u32 %v1895_v36, %v1679_v35 }
   0xb   :  { %v1894_v42 = vld [vmem:[%s3115_s1 + $0x8c] sm:$0xf]  ;;  %v1689_v43 = vld [vmem:[%s3115_s1 + $0x98] sm:$0xf0]  ;;  %v1684_v45 = vor.u32 %v1893_v37, %v1681_v39  ;;  %v1688_v46 = vor.u32 %v1896_v41, %v1687_v40  ;;  %v1663_v47 = vld [vmem:[%s3115_s1 + $0x60] sm:$0xf] }
   0xc   :  { %289 = vmatpush.bf16.msra.mxu0 %v1696_v29  ;;  %v1891_v48 = vld [vmem:[%s3115_s1 + $0x6c] sm:$0xf0]  ;;  %v1889_v49 = vld [vmem:[%s3115_s1 + $0x64] sm:$0xf]  ;;  %v1692_v50 = vor.u32 %v1894_v42, %v1689_v43  ;;  %v1665_v51 = vld [vmem:[%s3115_s1 + $0x70] sm:$0xf0] }
   0xd   :  { %338 = vmatpush.bf16.msra.mxu1 %v1700_v33  ;;  %387 = vmatpush.bf16.msra.mxu2 %v1704_v34  ;;  %v1671_v52 = vld [vmem:[%s3115_s1 + $0x68] sm:$0xf]  ;;  %v1892_v53 = vld [vmem:[%s3115_s1 + $0x74] sm:$0xf0]  ;;  %v1890_v54 = vld [vmem:[%s3115_s1 + $0x6c] sm:$0xf]  ;;  %v1664_v56 = vor.u32 %v1891_v48, %v1663_v47  ;;  %v1668_v57 = vor.u32 %v1889_v49, %v1665_v51 }
   0xe   :  { %436 = vmatpush.bf16.msra.mxu3 %v1708_v38  ;;  %v1673_v55 = vld [vmem:[%s3115_s1 + $0x78] sm:$0xf0]  ;;  %v1672_v58 = vor.u32 %v1892_v53, %v1671_v52  ;;  %v1647_v59 = vld [vmem:[%s3115_s1 + $0x40] sm:$0xf]  ;;  %v1887_v60 = vld [vmem:[%s3115_s1 + $0x4c] sm:$0xf0] }
   0xf   :  { %v1885_v61 = vld [vmem:[%s3115_s1 + $0x44] sm:$0xf]  ;;  %v1676_v62 = vor.u32 %v1890_v54, %v1673_v55  ;;  %v1649_v63 = vld [vmem:[%s3115_s1 + $0x50] sm:$0xf0]  ;;  %v1655_v0 = vld [vmem:[%s3115_s1 + $0x48] sm:$0xf]  ;;  %v1648_v4 = vor.u32 %v1887_v60, %v1647_v59 }
  0x10   :  { %290 = vmatpush.bf16.msra.mxu0 %v1680_v44  ;;  %v1888_v1 = vld [vmem:[%s3115_s1 + $0x54] sm:$0xf0]  ;;  %v1886_v2 = vld [vmem:[%s3115_s1 + $0x4c] sm:$0xf]  ;;  %v1657_v3 = vld [vmem:[%s3115_s1 + $0x58] sm:$0xf0]  ;;  %v1652_v6 = vor.u32 %v1885_v61, %v1649_v63 }
  0x11   :  { %339 = vmatpush.bf16.msra.mxu1 %v1684_v45  ;;  %388 = vmatpush.bf16.msra.mxu2 %v1688_v46  ;;  %v1631_v5 = vld [vmem:[%s3115_s1 + $0x20] sm:$0xf]  ;;  %v1656_v7 = vor.u32 %v1888_v1, %v1655_v0  ;;  %v1883_v8 = vld [vmem:[%s3115_s1 + $0x2c] sm:$0xf0]  ;;  %v1881_v9 = vld [vmem:[%s3115_s1 + $0x24] sm:$0xf]  ;;  %v1660_v11 = vor.u32 %v1886_v2, %v1657_v3 }
  0x12   :  { %437 = vmatpush.bf16.msra.mxu3 %v1692_v50  ;;  %v1633_v10 = vld [vmem:[%s3115_s1 + $0x30] sm:$0xf0]  ;;  %v1639_v12 = vld [vmem:[%s3115_s1 + $0x28] sm:$0xf]  ;;  %v1884_v13 = vld [vmem:[%s3115_s1 + $0x34] sm:$0xf0] }
  0x13   :  { %v1882_v14 = vld [vmem:[%s3115_s1 + $0x2c] sm:$0xf]  ;;  %v1641_v15 = vld [vmem:[%s3115_s1 + $0x38] sm:$0xf0] }
  0x14   :  { %291 = vmatpush.bf16.msra.mxu0 %v1664_v56 }
  0x15   :  { %340 = vmatpush.bf16.msra.mxu1 %v1668_v57  ;;  %389 = vmatpush.bf16.msra.mxu2 %v1672_v58 }
  0x16   :  { %438 = vmatpush.bf16.msra.mxu3 %v1676_v62 }
  0x17   :  { %10 = vsyncpa [#allocation3], 0  ;;  %v1632_v16 = vor.u32 %v1883_v8, %v1631_v5  ;;  %v1636_v17 = vor.u32 %v1881_v9, %v1633_v10  ;;  %v1640_v18 = vor.u32 %v1884_v13, %v1639_v12  ;;  %v1615_v19 = vld [vmem:[%s3115_s1] sm:$0xf]  ;;  %v1879_v20 = vld [vmem:[%s3115_s1 + $0xc] sm:$0xf0]  ;;  %v1644_v22 = vor.u32 %v1882_v14, %v1641_v15 }
  0x18   :  { %292 = vmatpush.bf16.msra.mxu0 %v1648_v4  ;;  %v1877_v21 = vld [vmem:[%s3115_s1 + $0x4] sm:$0xf]  ;;  %v1617_v23 = vld [vmem:[%s3115_s1 + $0x10] sm:$0xf0]  ;;  %v1623_v24 = vld [vmem:[%s3115_s1 + $0x8] sm:$0xf]  ;;  %v1616_v28 = vor.u32 %v1879_v20, %v1615_v19 }
  0x19   :  { %341 = vmatpush.bf16.msra.mxu1 %v1652_v6  ;;  %390 = vmatpush.bf16.msra.mxu2 %v1656_v7  ;;  %v1880_v25 = vld [vmem:[%s3115_s1 + $0x14] sm:$0xf0]  ;;  %v1878_v26 = vld [vmem:[%s3115_s1 + $0xc] sm:$0xf]  ;;  %v1625_v27 = vld [vmem:[%s3115_s1 + $0x18] sm:$0xf0]  ;;  %v1620_v29 = vor.u32 %v1877_v21, %v1617_v23 }
  0x1a   :  { %439 = vmatpush.bf16.msra.mxu3 %v1660_v11  ;;  %v1624_v30 = vor.u32 %v1880_v25, %v1623_v24  ;;  %v1628_v31 = vor.u32 %v1878_v26, %v1625_v27  ;;  %v1869_v32 = vld [vmem:[%s3114_s0] sm:$0xff]  ;;  %v1932_v33 = vld [vmem:[%s3117_s3 + $0xb8] sm:$0xff]  ;;  %v1870_v37 = vld [vmem:[%s3114_s0 + $0x8] sm:$0xff]  ;;  %s1569_s26 = sshll.u32 %s3119_s5, 4  ;;  %s2100_s27 = smov 128   ;;  %s1570_s26 = int_to_ptr.hbm [resolvable:$true] %s1569_s26 }
  0x1b   :  { %v1916_v34 = vld [vmem:[%s3117_s3 + $0x38] sm:$0xff]  ;;  %v1931_v38 = vld [vmem:[%s3117_s3 + $0xb0] sm:$0xff]  ;;  %v1930_v43 = vld [vmem:[%s3117_s3 + $0xa8] sm:$0xff]  ;;  %s2101_s28 = smov 8  }
  0x1c   :  { %293 = vmatpush.bf16.msra.mxu0 %v1632_v16  ;;  %v1940_v35 = vld [vmem:[%s3117_s3 + $0xf8] sm:$0xff]  ;;  %v1915_v39 = vld [vmem:[%s3117_s3 + $0x30] sm:$0xff]  ;;  %v1914_v44 = vld [vmem:[%s3117_s3 + $0x28] sm:$0xff] }
  0x1d   :  { %342 = vmatpush.bf16.msra.mxu1 %v1636_v17  ;;  %391 = vmatpush.bf16.msra.mxu2 %v1640_v18  ;;  %v1924_v36 = vld [vmem:[%s3117_s3 + $0x78] sm:$0xff]  ;;  %v1939_v40 = vld [vmem:[%s3117_s3 + $0xf0] sm:$0xff]  ;;  %v1938_v45 = vld [vmem:[%s3117_s3 + $0xe8] sm:$0xff] }
  0x1e   :  { %440 = vmatpush.bf16.msra.mxu3 %v1644_v22  ;;  %v1923_v41 = vld [vmem:[%s3117_s3 + $0x70] sm:$0xff]  ;;  %v1922_v46 = vld [vmem:[%s3117_s3 + $0x68] sm:$0xff]  ;;  %v1872_v47 = vld [vmem:[%s3114_s0 + $0x18] sm:$0xff] }
  0x1f   :  { %v1871_v42 = vld [vmem:[%s3114_s0 + $0x10] sm:$0xff]  ;;  %v1929_v48 = vld [vmem:[%s3117_s3 + $0xa0] sm:$0xff]  ;;  %v1928_v53 = vld [vmem:[%s3117_s3 + $0x98] sm:$0xff] }
  0x20   :  { %294 = vmatpush.bf16.msra.mxu0 %v1616_v28  ;;  %v1913_v49 = vld [vmem:[%s3117_s3 + $0x20] sm:$0xff]  ;;  %v1912_v54 = vld [vmem:[%s3117_s3 + $0x18] sm:$0xff]  ;;  %v1874_v57 = vld [vmem:[%s3114_s0 + $0x28] sm:$0xff] }
  0x21   :  { %343 = vmatpush.bf16.msra.mxu1 %v1620_v29  ;;  %392 = vmatpush.bf16.msra.mxu2 %v1624_v30  ;;  %v1937_v50 = vld [vmem:[%s3117_s3 + $0xe0] sm:$0xff]  ;;  %v1936_v55 = vld [vmem:[%s3117_s3 + $0xd8] sm:$0xff]  ;;  %v1927_v58 = vld [vmem:[%s3117_s3 + $0x90] sm:$0xff] }
  0x22   :  { %441 = vmatpush.bf16.msra.mxu3 %v1628_v31  ;;  %v1921_v51 = vld [vmem:[%s3117_s3 + $0x60] sm:$0xff]  ;;  %v1920_v56 = vld [vmem:[%s3117_s3 + $0x58] sm:$0xff]  ;;  %v1911_v59 = vld [vmem:[%s3117_s3 + $0x10] sm:$0xff] }
  0x23   :  { %295 = vmatmul.bf16.vlgmr.msra.gmra.mxu0 %v1869_v32  ;;  %v1873_v52 = vld [vmem:[%s3114_s0 + $0x20] sm:$0xff]  ;;  %v1935_v60 = vld [vmem:[%s3117_s3 + $0xd0] sm:$0xff]  ;;  %v1876_v63 = vld [vmem:[%s3114_s0 + $0x38] sm:$0xff] }
  0x24   :  { %344 = vmatmul.bf16.vlgmr.msra.gmra.mxu1 %v1869_v32  ;;  %393 = vmatmul.bf16.vlgmr.msra.gmra.mxu2 %v1869_v32  ;;  %v1919_v61 = vld [vmem:[%s3117_s3 + $0x50] sm:$0xff]  ;;  %v1926_v0 = vld [vmem:[%s3117_s3 + $0x88] sm:$0xff]  ;;  %v69_v3 = vld [vmem:[%s3116_s2] sm:$0xf] }
  0x25   :  { %442 = vmatmul.bf16.vlgmr.msra.gmra.mxu3 %v1869_v32  ;;  %1449 = vmatpush.bf16.msrb.mxu2 %v1932_v33  ;;  %v1875_v62 = vld [vmem:[%s3114_s0 + $0x30] sm:$0xff]  ;;  %v1910_v1 = vld [vmem:[%s3117_s3 + $0x8] sm:$0xff]  ;;  %v2435_v5 = vperm.slane %v69_v3, 0  ;;  %v2437_v6 = vperm.slane %v69_v3, 1  ;;  %v1925_v10 = vld [vmem:[%s3117_s3 + $0x80] sm:$0xff]  ;;  %v2461_v17 = vperm.slane %v69_v3, 2 }
  0x26   :  { %1351 = vmatpush.bf16.msrb.mxu0 %v1916_v34  ;;  %1498 = vmatpush.bf16.msrb.mxu3 %v1940_v35  ;;  %v1934_v2 = vld [vmem:[%s3117_s3 + $0xc8] sm:$0xff]  ;;  %v1909_v11 = vld [vmem:[%s3117_s3] sm:$0xff]  ;;  %v2464_v19 = vperm.slane %v69_v3, 3 }
  0x27   :  { %1400 = vmatpush.bf16.msrb.mxu1 %v1924_v36  ;;  %v1918_v4 = vld [vmem:[%s3117_s3 + $0x48] sm:$0xff]  ;;  %v1933_v12 = vld [vmem:[%s3117_s3 + $0xc0] sm:$0xff] }
  0x28   :  { %v1917_v14 = vld [vmem:[%s3117_s3 + $0x40] sm:$0xff] }
  0x29   :  { %1450 = vmatpush.bf16.msrb.mxu2 %v1931_v38 }
  0x2a   :  { %1352 = vmatpush.bf16.msrb.mxu0 %v1915_v39  ;;  %1499 = vmatpush.bf16.msrb.mxu3 %v1939_v40 }
  0x2b   :  { %1401 = vmatpush.bf16.msrb.mxu1 %v1923_v41 }
  0x2d   :  { %1451 = vmatpush.bf16.msrb.mxu2 %v1930_v43 }
  0x2e   :  { %1353 = vmatpush.bf16.msrb.mxu0 %v1914_v44  ;;  %1500 = vmatpush.bf16.msrb.mxu3 %v1938_v45 }
  0x2f   :  { %1402 = vmatpush.bf16.msrb.mxu1 %v1922_v46 }
  0x31   :  { %1452 = vmatpush.bf16.msrb.mxu2 %v1929_v48 }
  0x32   :  { %1354 = vmatpush.bf16.msrb.mxu0 %v1913_v49  ;;  %1501 = vmatpush.bf16.msrb.mxu3 %v1937_v50 }
  0x33   :  { %300 = vmatmul.bf16.gmra.mxu0 %v1870_v37  ;;  %1403 = vmatpush.bf16.msrb.mxu1 %v1921_v51 }
  0x34   :  { %349 = vmatmul.bf16.gmra.mxu1 %v1870_v37  ;;  %398 = vmatmul.bf16.gmra.mxu2 %v1870_v37 }
  0x35   :  { %447 = vmatmul.bf16.gmra.mxu3 %v1870_v37  ;;  %1453 = vmatpush.bf16.msrb.mxu2 %v1928_v53 }
  0x36   :  { %1355 = vmatpush.bf16.msrb.mxu0 %v1912_v54  ;;  %1502 = vmatpush.bf16.msrb.mxu3 %v1936_v55 }
  0x37   :  { %1404 = vmatpush.bf16.msrb.mxu1 %v1920_v56 }
  0x39   :  { %1454 = vmatpush.bf16.msrb.mxu2 %v1927_v58 }
  0x3a   :  { %1356 = vmatpush.bf16.msrb.mxu0 %v1911_v59  ;;  %1503 = vmatpush.bf16.msrb.mxu3 %v1935_v60 }
  0x3b   :  { %1405 = vmatpush.bf16.msrb.mxu1 %v1919_v61 }
  0x3d   :  { %1455 = vmatpush.bf16.msrb.mxu2 %v1926_v0 }
  0x3e   :  { %1357 = vmatpush.bf16.msrb.mxu0 %v1910_v1  ;;  %1504 = vmatpush.bf16.msrb.mxu3 %v1934_v2 }
  0x3f   :  { %1406 = vmatpush.bf16.msrb.mxu1 %v1918_v4 }
  0x41   :  { %1456 = vmatpush.bf16.msrb.mxu2 %v1925_v10 }
  0x42   :  { %1358 = vmatpush.bf16.msrb.mxu0 %v1909_v11  ;;  %1505 = vmatpush.bf16.msrb.mxu3 %v1933_v12 }
  0x43   :  { %305 = vmatmul.bf16.gmra.mxu0 %v1871_v42  ;;  %1407 = vmatpush.bf16.msrb.mxu1 %v1917_v14 }
  0x44   :  { %354 = vmatmul.bf16.gmra.mxu1 %v1871_v42  ;;  %403 = vmatmul.bf16.gmra.mxu2 %v1871_v42 }
  0x45   :  { %452 = vmatmul.bf16.gmra.mxu3 %v1871_v42 }
  0x53   :  { %310 = vmatmul.bf16.gmra.mxu0 %v1872_v47 }
  0x54   :  { %359 = vmatmul.bf16.gmra.mxu1 %v1872_v47  ;;  %408 = vmatmul.bf16.gmra.mxu2 %v1872_v47 }
  0x55   :  { %457 = vmatmul.bf16.gmra.mxu3 %v1872_v47 }
  0x63   :  { %315 = vmatmul.bf16.gmra.mxu0 %v1873_v52 }
  0x64   :  { %364 = vmatmul.bf16.gmra.mxu1 %v1873_v52  ;;  %413 = vmatmul.bf16.gmra.mxu2 %v1873_v52 }
  0x65   :  { %462 = vmatmul.bf16.gmra.mxu3 %v1873_v52 }
  0x73   :  { %320 = vmatmul.bf16.gmra.mxu0 %v1874_v57 }
  0x74   :  { %369 = vmatmul.bf16.gmra.mxu1 %v1874_v57  ;;  %418 = vmatmul.bf16.gmra.mxu2 %v1874_v57 }
  0x75   :  { %467 = vmatmul.bf16.gmra.mxu3 %v1874_v57 }
  0x83   :  { %325 = vmatmul.bf16.gmra.mxu0 %v1875_v62 }
  0x84   :  { %374 = vmatmul.bf16.gmra.mxu1 %v1875_v62  ;;  %423 = vmatmul.bf16.gmra.mxu2 %v1875_v62 }
  0x85   :  { %472 = vmatmul.bf16.gmra.mxu3 %v1875_v62 }
  0x93   :  { %330 = vmatmul.bf16.gmra.mxu0 %v1876_v63 }
  0x94   :  { %379 = vmatmul.bf16.gmra.mxu1 %v1876_v63  ;;  %428 = vmatmul.bf16.gmra.mxu2 %v1876_v63 }
  0x95   :  { %477 = vmatmul.bf16.gmra.mxu3 %v1876_v63 }
  0xa0   :  { %v296_v7 = vpop.f32.mrf.mxu0 }
  0xa1   :  { %v2440_v8 = vadd.f32 %v296_v7, %v2435_v5  ;;  %v345_v9 = vpop.f32.mrf.mxu1 }
  0xa2   :  { %v2452_v13 = vadd.f32 %v345_v9, %v2437_v6 }
  0xa3   :  { %v483_v15 = vmul.f32 %v2440_v8, %v2440_v8 }
  0xa4   :  { %v484_v16 = vmul.f32 %v2452_v13, %v2452_v13 }
  0xa5   :  { %v547_v18 = vmul.f32 %v483_v15, %v2440_v8 }
  0xa6   :  { %v548_v20 = vmul.f32 %v484_v16, %v2452_v13 }
  0xa7   :  { %v611_v21 = vmul.f32 0.044715, %v547_v18  ;;  %v394_v22 = vpop.f32.mrf.mxu2 }
  0xa8   :  { %v612_v23 = vmul.f32 0.044715, %v548_v20  ;;  %v2468_v24 = vadd.f32 %v394_v22, %v2461_v17  ;;  %v443_v25 = vpop.f32.mrf.mxu3  ;;  %v298_v26 = vpop.f32.mrf.mxu0 }
  0xa9   :  { %v675_v27 = vadd.f32 %v611_v21, %v2440_v8  ;;  %v2472_v28 = vadd.f32 %v443_v25, %v2464_v19  ;;  %v2475_v29 = vadd.f32 %v298_v26, %v2435_v5  ;;  %v347_v30 = vpop.f32.mrf.mxu1 }
  0xaa   :  { %v676_v31 = vadd.f32 %v612_v23, %v2452_v13  ;;  %v485_v32 = vmul.f32 %v2468_v24, %v2468_v24  ;;  %v2481_v33 = vadd.f32 %v347_v30, %v2437_v6 }
  0xab   :  { %v739_v34 = vmul.f32 0.7978846, %v675_v27  ;;  %v486_v35 = vmul.f32 %v2472_v28, %v2472_v28  ;;  %v487_v36 = vmul.f32 %v2475_v29, %v2475_v29 }
  0xac   :  { %v740_v37 = vmul.f32 0.7978846, %v676_v31  ;;  %v549_v38 = vmul.f32 %v485_v32, %v2468_v24  ;;  %v488_v39 = vmul.f32 %v2481_v33, %v2481_v33 }
  0xad   :  { %1945 = vtanh.f32 %v739_v34  ;;  %v550_v40 = vmul.f32 %v486_v35, %v2472_v28  ;;  %v551_v41 = vmul.f32 %v487_v36, %v2475_v29 }
  0xae   :  { %1947 = vtanh.f32 %v740_v37  ;;  %v613_v42 = vmul.f32 0.044715, %v549_v38  ;;  %v552_v43 = vmul.f32 %v488_v39, %v2481_v33 }
  0xaf   :  { %v614_v44 = vmul.f32 0.044715, %v550_v40  ;;  %v615_v45 = vmul.f32 0.044715, %v551_v41  ;;  %v396_v46 = vpop.f32.mrf.mxu2 }
  0xb0   :  { %v677_v47 = vadd.f32 %v613_v42, %v2468_v24  ;;  %v616_v48 = vmul.f32 0.044715, %v552_v43  ;;  %v2495_v49 = vadd.f32 %v396_v46, %v2461_v17  ;;  %v445_v50 = vpop.f32.mrf.mxu3  ;;  %v301_v51 = vpop.f32.mrf.mxu0 }
  0xb1   :  { %v678_v52 = vadd.f32 %v614_v44, %v2472_v28  ;;  %v679_v53 = vadd.f32 %v615_v45, %v2475_v29  ;;  %v2500_v54 = vadd.f32 %v445_v50, %v2464_v19  ;;  %v2503_v55 = vadd.f32 %v301_v51, %v2435_v5  ;;  %v350_v56 = vpop.f32.mrf.mxu1 }
  0xb2   :  { %v741_v57 = vmul.f32 0.7978846, %v677_v47  ;;  %v680_v58 = vadd.f32 %v616_v48, %v2481_v33  ;;  %v489_v59 = vmul.f32 %v2495_v49, %v2495_v49  ;;  %v2509_v60 = vadd.f32 %v350_v56, %v2437_v6 }
  0xb3   :  { %v1946_v61 = vpop.eup %1945  ;;  %v742_v62 = vmul.f32 0.7978846, %v678_v52  ;;  %v743_v63 = vmul.f32 0.7978846, %v679_v53  ;;  %v490_v0 = vmul.f32 %v2500_v54, %v2500_v54  ;;  %v491_v1 = vmul.f32 %v2503_v55, %v2503_v55 }
  0xb4   :  { %v1948_v2 = vpop.eup %1947  ;;  %1949 = vtanh.f32 %v741_v57  ;;  %v744_v3 = vmul.f32 0.7978846, %v680_v58  ;;  %v553_v4 = vmul.f32 %v489_v59, %v2495_v49  ;;  %v492_v7 = vmul.f32 %v2509_v60, %v2509_v60 }
  0xb5   :  { %1951 = vtanh.f32 %v742_v62  ;;  %v554_v9 = vmul.f32 %v490_v0, %v2500_v54  ;;  %v555_v10 = vmul.f32 %v491_v1, %v2503_v55  ;;  %v867_v11 = vadd.f32 1.0, %v1946_v61 }
  0xb6   :  { %v617_v12 = vmul.f32 0.044715, %v553_v4  ;;  %v556_v14 = vmul.f32 %v492_v7, %v2509_v60  ;;  %1953 = vtanh.f32 %v743_v63  ;;  %v868_v15 = vadd.f32 1.0, %v1948_v2 }
  0xb7   :  { %v618_v16 = vmul.f32 0.044715, %v554_v9  ;;  %v619_v18 = vmul.f32 0.044715, %v555_v10  ;;  %v399_v20 = vpop.f32.mrf.mxu2  ;;  %v931_v21 = vmul.f32 0.5, %v867_v11  ;;  %1955 = vtanh.f32 %v744_v3 }
  0xb8   :  { %v681_v22 = vadd.f32 %v617_v12, %v2495_v49  ;;  %v620_v23 = vmul.f32 0.044715, %v556_v14  ;;  %v2523_v25 = vadd.f32 %v399_v20, %v2461_v17  ;;  %v448_v26 = vpop.f32.mrf.mxu3  ;;  %v303_v27 = vpop.f32.mrf.mxu0  ;;  %v932_v30 = vmul.f32 0.5, %v868_v15 }
  0xb9   :  { %v682_v31 = vadd.f32 %v618_v16, %v2500_v54  ;;  %v2527_v32 = vadd.f32 %v619_v18, %v2503_v55  ;;  %v2530_v34 = vadd.f32 %v448_v26, %v2464_v19  ;;  %v2533_v35 = vadd.f32 %v303_v27, %v2435_v5  ;;  %v352_v36 = vpop.f32.mrf.mxu1 }
  0xba   :  { %v1950_v37 = vpop.eup %1949  ;;  %v745_v38 = vmul.f32 0.7978846, %v681_v22  ;;  %v2536_v39 = vadd.f32 %v620_v23, %v2509_v60  ;;  %v493_v40 = vmul.f32 %v2523_v25, %v2523_v25  ;;  %v2541_v41 = vadd.f32 %v352_v36, %v2437_v6 }
  0xbb   :  { %v1952_v42 = vpop.eup %1951  ;;  %v746_v43 = vmul.f32 0.7978846, %v682_v31  ;;  %v494_v44 = vmul.f32 %v2530_v34, %v2530_v34  ;;  %v495_v45 = vmul.f32 %v2533_v35, %v2533_v35  ;;  %v995_v46 = vmul.f32 %v931_v21, %v2440_v8 }
  0xbc   :  { %v1954_v47 = vpop.eup %1953  ;;  %v557_v48 = vmul.f32 %v493_v40, %v2523_v25  ;;  %v496_v50 = vmul.f32 %v2541_v41, %v2541_v41  ;;  %v996_v51 = vmul.f32 %v932_v30, %v2452_v13  ;;  %1957 = vtanh.f32 %v745_v38 }
  0xbd   :  { %v1956_v52 = vpop.eup %1955  ;;  %v558_v53 = vmul.f32 %v494_v44, %v2530_v34  ;;  %v559_v56 = vmul.f32 %v495_v45, %v2533_v35  ;;  %v871_v57 = vadd.f32 1.0, %v1954_v47  ;;  %v869_v58 = vadd.f32 1.0, %v1950_v37 }
  0xbe   :  { %v621_v59 = vmul.f32 0.044715, %v557_v48  ;;  %v560_v61 = vmul.f32 %v496_v50, %v2541_v41  ;;  %v872_v8 = vadd.f32 1.0, %v1956_v52  ;;  %1959 = vtanh.f32 %v746_v43 }
  0xbf   :  { %v622_v62 = vmul.f32 0.044715, %v558_v53  ;;  %v623_v63 = vmul.f32 0.044715, %v559_v56  ;;  %v401_v0 = vpop.f32.mrf.mxu2  ;;  %v935_v1 = vmul.f32 0.5, %v871_v57  ;;  %v933_v2 = vmul.f32 0.5, %v869_v58 }
  0xc0   :  { %v2556_v13 = vadd.f32 %v621_v59, %v2523_v25  ;;  %v624_v3 = vmul.f32 0.044715, %v560_v61  ;;  %v2559_v4 = vadd.f32 %v401_v0, %v2461_v17  ;;  %v450_v7 = vpop.f32.mrf.mxu3  ;;  %v306_v9 = vpop.f32.mrf.mxu0  ;;  %v936_v10 = vmul.f32 0.5, %v872_v8 }
  0xc1   :  { %v2562_v11 = vadd.f32 %v622_v62, %v2530_v34  ;;  %v2565_v12 = vadd.f32 %v450_v7, %v2464_v19  ;;  %v2568_v14 = vadd.f32 %v306_v9, %v2435_v5  ;;  %v355_v15 = vpop.f32.mrf.mxu1  ;;  %v999_v16 = vmul.f32 %v935_v1, %v2475_v29 }
  0xc2   :  { %v1958_v18 = vpop.eup %1957  ;;  %v497_v20 = vmul.f32 %v2559_v4, %v2559_v4  ;;  %v2574_v21 = vadd.f32 %v355_v15, %v2437_v6  ;;  %v1000_v22 = vmul.f32 %v936_v10, %v2481_v33  ;;  %v997_v23 = vmul.f32 %v933_v2, %v2468_v24 }
  0xc3   :  { %v498_v26 = vmul.f32 %v2565_v12, %v2565_v12  ;;  %v499_v27 = vmul.f32 %v2568_v14, %v2568_v14  ;;  %v1059_v30 = vpack.c.bf16 %v999_v16, %v995_v46  ;;  %v873_v31 = vadd.f32 1.0, %v1958_v18 }
  0xc4   :  { %v1960_v29 = vpop.eup %1959  ;;  %v561_v36 = vmul.f32 %v497_v20, %v2559_v4  ;;  %v500_v37 = vmul.f32 %v2574_v21, %v2574_v21  ;;  %v1060_v38 = vpack.c.bf16 %v1000_v22, %v996_v51  ;;  %v870_v40 = vadd.f32 1.0, %v1952_v42 }
  0xc5   :  { %v562_v33 = vmul.f32 %v498_v26, %v2565_v12  ;;  %v563_v24 = vmul.f32 %v499_v27, %v2568_v14  ;;  %1359 = vmatmul.bf16.vlgmr.msrb.gmra.mxu0 %v1059_v30  ;;  %v937_v43 = vmul.f32 0.5, %v873_v31  ;;  %v874_v44 = vadd.f32 1.0, %v1960_v29 }
  0xc6   :  { %v625_v45 = vmul.f32 0.044715, %v561_v36  ;;  %v564_v47 = vmul.f32 %v500_v37, %v2574_v21  ;;  %1408 = vmatmul.bf16.vlgmr.msrb.gmra.mxu1 %v1060_v38  ;;  %v934_v46 = vmul.f32 0.5, %v870_v40  ;;  %v687_v48 = vadd.f32 %v623_v63, %v2533_v35 }
  0xc7   :  { %v2589_v50 = vmul.f32 0.044715, %v562_v33  ;;  %v627_v52 = vmul.f32 0.044715, %v563_v24  ;;  %v404_v53 = vpop.f32.mrf.mxu2  ;;  %v1001_v42 = vmul.f32 %v937_v43, %v2495_v49  ;;  %v938_v51 = vmul.f32 0.5, %v874_v44 }
  0xc8   :  { %v628_v56 = vmul.f32 0.044715, %v564_v47  ;;  %v2593_v57 = vadd.f32 %v404_v53, %v2461_v17  ;;  %v453_v58 = vpop.f32.mrf.mxu3  ;;  %v308_v59 = vpop.f32.mrf.mxu0  ;;  %v998_v61 = vmul.f32 %v934_v46, %v2472_v28  ;;  %v747_v8 = vmul.f32 0.7978846, %v2527_v32 }
  0xc9   :  { %v2598_v62 = vadd.f32 %v627_v52, %v2568_v14  ;;  %v2601_v63 = vadd.f32 %v453_v58, %v2464_v19  ;;  %v2604_v0 = vadd.f32 %v308_v59, %v2435_v5  ;;  %v357_v49 = vpop.f32.mrf.mxu1  ;;  %v1061_v1 = vpack.c.bf16 %v1001_v42, %v997_v23 }
  0xca   :  { %v2607_v2 = vadd.f32 %v628_v56, %v2574_v21  ;;  %v501_v7 = vmul.f32 %v2593_v57, %v2593_v57  ;;  %v2612_v28 = vadd.f32 %v357_v49, %v2437_v6  ;;  %v1002_v32 = vmul.f32 %v938_v51, %v2500_v54 }
  0xcb   :  { %v502_v9 = vmul.f32 %v2601_v63, %v2601_v63  ;;  %v503_v10 = vmul.f32 %v2604_v0, %v2604_v0  ;;  %1457 = vmatmul.bf16.vlgmr.msrb.gmra.mxu2 %v1061_v1  ;;  %v751_v15 = vmul.f32 0.7978846, %v687_v48  ;;  %1961 = vtanh.f32 %v747_v8 }
  0xcc   :  { %v565_v16 = vmul.f32 %v501_v7, %v2593_v57  ;;  %v504_v18 = vmul.f32 %v2612_v28, %v2612_v28  ;;  %v1062_v20 = vpack.c.bf16 %v1002_v32, %v998_v61  ;;  %v688_v22 = vadd.f32 %v624_v3, %v2541_v41 }
  0xcd   :  { %v566_v23 = vmul.f32 %v502_v9, %v2601_v63  ;;  %v567_v54 = vmul.f32 %v503_v10, %v2604_v0  ;;  %1963 = vtanh.f32 %v751_v15  ;;  %v748_v26 = vmul.f32 0.7978846, %v2536_v39 }
  0xce   :  { %v629_v27 = vmul.f32 0.044715, %v565_v16  ;;  %v568_v30 = vmul.f32 %v504_v18, %v2612_v28  ;;  %1506 = vmatmul.bf16.vlgmr.msrb.gmra.mxu3 %v1062_v20  ;;  %v752_v31 = vmul.f32 0.7978846, %v688_v22  ;;  %v689_v29 = vadd.f32 %v625_v45, %v2559_v4 }
  0xcf   :  { %v630_v36 = vmul.f32 0.044715, %v566_v23  ;;  %v2628_v37 = vmul.f32 0.044715, %v567_v54  ;;  %v406_v38 = vpop.f32.mrf.mxu2  ;;  %1965 = vtanh.f32 %v748_v26  ;;  %v749_v3 = vmul.f32 0.7978846, %v2556_v13 }
  0xd0   :  { %v2632_v40 = vadd.f32 %v629_v27, %v2593_v57  ;;  %v2634_v33 = vmul.f32 0.044715, %v568_v30  ;;  %v2637_v39 = vadd.f32 %v406_v38, %v2461_v17  ;;  %v455_v24 = vpop.f32.mrf.mxu3  ;;  %v311_v43 = vpop.f32.mrf.mxu0  ;;  %1967 = vtanh.f32 %v752_v31 }
  0xd1   :  { %v1962_v44 = vpop.eup %1961  ;;  %v2640_v45 = vadd.f32 %v630_v36, %v2601_v63  ;;  %v2643_v47 = vadd.f32 %v455_v24, %v2464_v19  ;;  %v2646_v13 = vadd.f32 %v311_v43, %v2435_v5  ;;  %v360_v46 = vpop.f32.mrf.mxu1  ;;  %v753_v48 = vmul.f32 0.7978846, %v689_v29 }
  0xd2   :  { %v505_v52 = vmul.f32 %v2637_v39, %v2637_v39  ;;  %v2651_v53 = vadd.f32 %v360_v46, %v2437_v6  ;;  %v875_v42 = vadd.f32 1.0, %v1962_v44  ;;  %1969 = vtanh.f32 %v749_v3 }
  0xd3   :  { %v1964_v51 = vpop.eup %1963  ;;  %v506_v56 = vmul.f32 %v2643_v47, %v2643_v47  ;;  %v507_v58 = vmul.f32 %v2646_v13, %v2646_v13  ;;  %1971 = vtanh.f32 %v753_v48  ;;  %v690_v59 = vadd.f32 %v2589_v50, %v2565_v12 }
  0xd4   :  { %v569_v61 = vmul.f32 %v505_v52, %v2637_v39  ;;  %v508_v8 = vmul.f32 %v2651_v53, %v2651_v53  ;;  %v879_v49 = vadd.f32 1.0, %v1964_v51  ;;  %v939_v1 = vmul.f32 0.5, %v875_v42 }
  0xd5   :  { %v1966_v7 = vpop.eup %1965  ;;  %v570_v32 = vmul.f32 %v506_v56, %v2643_v47  ;;  %v571_v9 = vmul.f32 %v507_v58, %v2646_v13  ;;  %v750_v10 = vmul.f32 0.7978846, %v2562_v11  ;;  %v754_v15 = vmul.f32 0.7978846, %v690_v59 }
  0xd6   :  { %v1968_v16 = vpop.eup %1967  ;;  %v2665_v18 = vmul.f32 0.044715, %v569_v61  ;;  %v572_v50 = vmul.f32 %v508_v8, %v2651_v53  ;;  %v943_v20 = vmul.f32 0.5, %v879_v49  ;;  %v1003_v22 = vmul.f32 %v939_v1, %v2503_v55 }
  0xd7   :  { %v2669_v23 = vmul.f32 0.044715, %v570_v32  ;;  %v635_v54 = vmul.f32 0.044715, %v571_v9  ;;  %v876_v26 = vadd.f32 1.0, %v1966_v7  ;;  %v880_v27 = vadd.f32 1.0, %v1968_v16  ;;  %v409_v30 = vpop.f32.mrf.mxu2 }
  0xd8   :  { %v1970_v31 = vpop.eup %1969  ;;  %v636_v29 = vmul.f32 0.044715, %v572_v50  ;;  %v1007_v36 = vmul.f32 %v943_v20, %v2533_v35  ;;  %v2673_v11 = vadd.f32 %v409_v30, %v2461_v17  ;;  %v458_v38 = vpop.f32.mrf.mxu3  ;;  %1973 = vtanh.f32 %v750_v10 }
  0xd9   :  { %v313_v3 = vpop.f32.mrf.mxu0  ;;  %v1972_v24 = vpop.eup %1971  ;;  %v2676_v43 = vadd.f32 %v635_v54, %v2646_v13  ;;  %v940_v55 = vmul.f32 0.5, %v876_v26  ;;  %v944_v44 = vmul.f32 0.5, %v880_v27  ;;  %v2679_v46 = vadd.f32 %v458_v38, %v2464_v19 }
  0xda   :  { %v362_v48 = vpop.f32.mrf.mxu1  ;;  %v2682_v52 = vadd.f32 %v636_v29, %v2651_v53  ;;  %v1063_v35 = vpack.c.bf16 %v1007_v36, %v1003_v22  ;;  %v509_v42 = vmul.f32 %v2673_v11, %v2673_v11  ;;  %v2687_v51 = vadd.f32 %v313_v3, %v2435_v5 }
  0xdb   :  { %v1004_v56 = vmul.f32 %v940_v55, %v2509_v60  ;;  %v1008_v58 = vmul.f32 %v944_v44, %v2541_v41  ;;  %v510_v59 = vmul.f32 %v2679_v46, %v2679_v46  ;;  %v2694_v61 = vadd.f32 %v362_v48, %v2437_v6 }
  0xdc   :  { %1364 = vmatmul.bf16.gmra.mxu0 %v1063_v35  ;;  %v573_v8 = vmul.f32 %v509_v42, %v2673_v11  ;;  %v511_v49 = vmul.f32 %v2687_v51, %v2687_v51  ;;  %v877_v1 = vadd.f32 1.0, %v1970_v31  ;;  %v881_v7 = vadd.f32 1.0, %v1972_v24 }
  0xdd   :  { %v1064_v32 = vpack.c.bf16 %v1008_v58, %v1004_v56  ;;  %v574_v9 = vmul.f32 %v510_v59, %v2679_v46  ;;  %v512_v60 = vmul.f32 %v2694_v61, %v2694_v61  ;;  %1975 = vtanh.f32 %v754_v15 }
  0xde   :  { %v1974_v41 = vpop.eup %1973  ;;  %v637_v10 = vmul.f32 0.044715, %v573_v8  ;;  %v575_v16 = vmul.f32 %v511_v49, %v2687_v51  ;;  %v941_v50 = vmul.f32 0.5, %v877_v1  ;;  %v945_v20 = vmul.f32 0.5, %v881_v7 }
  0xdf   :  { %1413 = vmatmul.bf16.gmra.mxu1 %v1064_v32  ;;  %v638_v22 = vmul.f32 0.044715, %v574_v9  ;;  %v576_v54 = vmul.f32 %v512_v60, %v2694_v61  ;;  %v878_v26 = vadd.f32 1.0, %v1974_v41  ;;  %v411_v27 = vpop.f32.mrf.mxu2  ;;  %v695_v30 = vadd.f32 %v2628_v37, %v2604_v0 }
  0xe0   :  { %v2707_v31 = vadd.f32 %v637_v10, %v2673_v11  ;;  %v2709_v29 = vmul.f32 0.044715, %v575_v16  ;;  %v1005_v15 = vmul.f32 %v941_v50, %v2523_v25  ;;  %v1009_v36 = vmul.f32 %v945_v20, %v2559_v4  ;;  %v460_v38 = vpop.f32.mrf.mxu3 }
  0xe1   :  { %v316_v3 = vpop.f32.mrf.mxu0  ;;  %v2714_v24 = vadd.f32 %v638_v22, %v2679_v46  ;;  %v2716_v55 = vmul.f32 0.044715, %v576_v54  ;;  %v942_v44 = vmul.f32 0.5, %v878_v26  ;;  %v2719_v48 = vadd.f32 %v411_v27, %v2461_v17 }
  0xe2   :  { %v365_v37 = vpop.f32.mrf.mxu1  ;;  %v1065_v35 = vpack.c.bf16 %v1009_v36, %v1005_v15  ;;  %v2722_v42 = vadd.f32 %v460_v38, %v2464_v19  ;;  %v2725_v25 = vadd.f32 %v316_v3, %v2435_v5  ;;  %v755_v8 = vmul.f32 0.7978846, %v2598_v62 }
  0xe3   :  { %v2728_v4 = vadd.f32 %v365_v37, %v2437_v6  ;;  %v1976_v56 = vpop.eup %1975  ;;  %v1006_v58 = vmul.f32 %v942_v44, %v2530_v34  ;;  %v513_v59 = vmul.f32 %v2719_v48, %v2719_v48  ;;  %v759_v49 = vmul.f32 0.7978846, %v695_v30 }
  0xe4   :  { %1462 = vmatmul.bf16.gmra.mxu2 %v1065_v35  ;;  %v882_v1 = vadd.f32 1.0, %v1976_v56  ;;  %v514_v7 = vmul.f32 %v2722_v42, %v2722_v42  ;;  %v515_v32 = vmul.f32 %v2725_v25, %v2725_v25  ;;  %1977 = vtanh.f32 %v755_v8 }
  0xe5   :  { %v516_v9 = vmul.f32 %v2728_v4, %v2728_v4  ;;  %v577_v60 = vmul.f32 %v513_v59, %v2719_v48  ;;  %v696_v34 = vadd.f32 %v2634_v33, %v2612_v28  ;;  %v756_v62 = vmul.f32 0.7978846, %v2607_v2 }
  0xe6   :  { %v946_v41 = vmul.f32 0.5, %v882_v1  ;;  %v578_v10 = vmul.f32 %v514_v7, %v2722_v42  ;;  %v579_v16 = vmul.f32 %v515_v32, %v2725_v25  ;;  %1979 = vtanh.f32 %v759_v49 }
  0xe7   :  { %v580_v50 = vmul.f32 %v516_v9, %v2728_v4  ;;  %v2747_v20 = vmul.f32 0.044715, %v577_v60  ;;  %v760_v22 = vmul.f32 0.7978846, %v696_v34  ;;  %v414_v54 = vpop.f32.mrf.mxu2  ;;  %v697_v26 = vadd.f32 %v2665_v18, %v2637_v39 }
  0xe8   :  { %v1010_v27 = vmul.f32 %v946_v41, %v2565_v12  ;;  %v2752_v33 = vmul.f32 0.044715, %v578_v10  ;;  %v643_v2 = vmul.f32 0.044715, %v579_v16  ;;  %v463_v15 = vpop.f32.mrf.mxu3  ;;  %1981 = vtanh.f32 %v756_v62 }
  0xe9   :  { %v644_v30 = vmul.f32 0.044715, %v580_v50  ;;  %v318_v36 = vpop.f32.mrf.mxu0  ;;  %v2755_v38 = vadd.f32 %v414_v54, %v2461_v17  ;;  %v2758_v3 = vadd.f32 %v463_v15, %v2464_v19  ;;  %1983 = vtanh.f32 %v760_v22 }
  0xea   :  { %v2761_v44 = vadd.f32 %v318_v36, %v2435_v5  ;;  %v367_v37 = vpop.f32.mrf.mxu1  ;;  %v1066_v18 = vpack.c.bf16 %v1010_v27, %v1006_v58  ;;  %v707_v12 = vadd.f32 %v643_v2, %v2725_v25  ;;  %v1978_v56 = vpop.eup %1977  ;;  %v698_v9 = vadd.f32 %v2669_v23, %v2643_v47 }
  0xeb   :  { %v708_v35 = vadd.f32 %v644_v30, %v2728_v4  ;;  %v517_v59 = vmul.f32 %v2755_v38, %v2755_v38  ;;  %v518_v8 = vmul.f32 %v2758_v3, %v2758_v3  ;;  %v2772_v1 = vadd.f32 %v367_v37, %v2437_v6 }
  0xec   :  { %v519_v49 = vmul.f32 %v2761_v44, %v2761_v44  ;;  %1511 = vmatmul.bf16.gmra.mxu3 %v1066_v18  ;;  %v771_v58 = vmul.f32 0.7978846, %v707_v12  ;;  %v883_v32 = vadd.f32 1.0, %v1978_v56  ;;  %v1980_v60 = vpop.eup %1979  ;;  %v757_v22 = vmul.f32 0.7978846, %v2632_v40 }
  0xed   :  { %v772_v7 = vmul.f32 0.7978846, %v708_v35  ;;  %v581_v34 = vmul.f32 %v517_v59, %v2755_v38  ;;  %v582_v62 = vmul.f32 %v518_v8, %v2758_v3  ;;  %v520_v10 = vmul.f32 %v2772_v1, %v2772_v1 }
  0xee   :  { %v583_v41 = vmul.f32 %v519_v49, %v2761_v44  ;;  %1985 = vtanh.f32 %v771_v58  ;;  %v887_v16 = vadd.f32 1.0, %v1980_v60  ;;  %v947_v50 = vmul.f32 0.5, %v883_v32  ;;  %v1982_v54 = vpop.eup %1981 }
  0xef   :  { %1987 = vtanh.f32 %v772_v7  ;;  %v645_v27 = vmul.f32 0.044715, %v581_v34  ;;  %v646_v2 = vmul.f32 0.044715, %v582_v62  ;;  %v1984_v30 = vpop.eup %1983  ;;  %v884_v37 = vadd.f32 1.0, %v1982_v54  ;;  %v416_v7 = vpop.f32.mrf.mxu2 }
  0xf0   :  { %v647_v23 = vmul.f32 0.044715, %v583_v41  ;;  %v951_v15 = vmul.f32 0.5, %v887_v16  ;;  %v1011_v36 = vmul.f32 %v947_v50, %v2568_v14  ;;  %v584_v18 = vmul.f32 %v520_v10, %v2772_v1  ;;  %v465_v14 = vpop.f32.mrf.mxu3 }
  0xf1   :  { %v888_v12 = vadd.f32 1.0, %v1984_v30  ;;  %v709_v35 = vadd.f32 %v645_v27, %v2755_v38  ;;  %v710_v56 = vadd.f32 %v646_v2, %v2758_v3  ;;  %v948_v8 = vmul.f32 0.5, %v884_v37  ;;  %v321_v54 = vpop.f32.mrf.mxu0 }
  0xf2   :  { %v711_v59 = vadd.f32 %v647_v23, %v2761_v44  ;;  %v1015_v40 = vmul.f32 %v951_v15, %v2604_v0  ;;  %v648_v49 = vmul.f32 0.044715, %v584_v18  ;;  %v761_v58 = vmul.f32 0.7978846, %v697_v26  ;;  %v370_v27 = vpop.f32.mrf.mxu1 }
  0xf3   :  { %v952_v32 = vmul.f32 0.5, %v888_v12  ;;  %v773_v60 = vmul.f32 0.7978846, %v709_v35  ;;  %v774_v34 = vmul.f32 0.7978846, %v710_v56  ;;  %1989 = vtanh.f32 %v757_v22 }
  0xf4   :  { %v2788_v62 = vpop.eup %1985  ;;  %v1067_v41 = vpack.c.bf16 %v1015_v40, %v1011_v36  ;;  %v1012_v10 = vmul.f32 %v948_v8, %v2574_v21  ;;  %v775_v16 = vmul.f32 0.7978846, %v711_v59  ;;  %v712_v50 = vadd.f32 %v648_v49, %v2772_v1 }
  0xf5   :  { %v2792_v0 = vpop.eup %1987  ;;  %v1016_v26 = vmul.f32 %v952_v32, %v2612_v28  ;;  %1991 = vtanh.f32 %v773_v60  ;;  %v758_v2 = vmul.f32 0.7978846, %v2640_v45  ;;  %v762_v23 = vmul.f32 0.7978846, %v698_v9 }
  0xf6   :  { %1369 = vmatmul.bf16.gmra.mxu0 %v1067_v41  ;;  %1993 = vtanh.f32 %v774_v34  ;;  %v776_v22 = vmul.f32 0.7978846, %v712_v50  ;;  %v2797_v30 = vadd.f32 %v416_v7, %v2461_v17  ;;  %v2800_v21 = vadd.f32 %v465_v14, %v2464_v19 }
  0xf7   :  { %v1068_v15 = vpack.c.bf16 %v1016_v26, %v1012_v10  ;;  %1995 = vtanh.f32 %v775_v16  ;;  %v2803_v36 = vadd.f32 %v321_v54, %v2435_v5  ;;  %v2806_v28 = vadd.f32 %v370_v27, %v2437_v6 }
  0xf8   :  { %1997 = vtanh.f32 %v776_v22  ;;  %v521_v45 = vmul.f32 %v2797_v30, %v2797_v30  ;;  %v522_v9 = vmul.f32 %v2800_v21, %v2800_v21  ;;  %v703_v37 = vadd.f32 %v2709_v29, %v2687_v51 }
  0xf9   :  { %v1990_v18 = vpop.eup %1989  ;;  %1418 = vmatmul.bf16.gmra.mxu1 %v1068_v15  ;;  %1999 = vtanh.f32 %v761_v58  ;;  %v523_v12 = vmul.f32 %v2803_v36, %v2803_v36  ;;  %v524_v35 = vmul.f32 %v2806_v28, %v2806_v28  ;;  %v763_v56 = vmul.f32 0.7978846, %v2676_v43  ;;  %v419_v43 = vpop.f32.mrf.mxu2 }
  0xfa   :  { %v885_v59 = vadd.f32 1.0, %v1990_v18  ;;  %2001 = vtanh.f32 %v758_v2  ;;  %v585_v40 = vmul.f32 %v521_v45, %v2797_v30  ;;  %v586_v8 = vmul.f32 %v522_v9, %v2800_v21 }
  0xfb   :  { %v2821_v49 = vpop.eup %1991  ;;  %2003 = vtanh.f32 %v762_v23  ;;  %v587_v29 = vmul.f32 %v523_v12, %v2803_v36  ;;  %v588_v58 = vmul.f32 %v524_v35, %v2806_v28  ;;  %v767_v7 = vmul.f32 0.7978846, %v703_v37 }
  0xfc   :  { %v2825_v32 = vpop.eup %1993  ;;  %v949_v60 = vmul.f32 0.5, %v885_v59  ;;  %v649_v34 = vmul.f32 0.044715, %v585_v40  ;;  %v650_v14 = vmul.f32 0.044715, %v586_v8  ;;  %2005 = vtanh.f32 %v763_v56 }
  0xfd   :  { %v2827_v41 = vpop.eup %1995  ;;  %v651_v10 = vmul.f32 0.044715, %v587_v29  ;;  %v652_v16 = vmul.f32 0.044715, %v588_v58  ;;  %2007 = vtanh.f32 %v767_v7  ;;  %v704_v50 = vadd.f32 %v2716_v55, %v2694_v61 }
  0xfe   :  { %v2831_v54 = vpop.eup %1997  ;;  %v1013_v27 = vmul.f32 %v949_v60, %v2593_v57  ;;  %v713_v26 = vadd.f32 %v649_v34, %v2797_v30  ;;  %v714_v2 = vadd.f32 %v650_v14, %v2800_v21  ;;  %v764_v23 = vmul.f32 0.7978846, %v2682_v52  ;;  %v468_v57 = vpop.f32.mrf.mxu3 }
  0xff   :  { %v2000_v22 = vpop.eup %1999  ;;  %v715_v15 = vadd.f32 %v651_v10, %v2803_v36  ;;  %v716_v45 = vadd.f32 %v652_v16, %v2806_v28  ;;  %v768_v9 = vmul.f32 0.7978846, %v704_v50  ;;  %v2840_v37 = vadd.f32 %v419_v43, %v2461_v17  ;;  %v323_v10 = vpop.f32.mrf.mxu0 }
 0x100   :  { %v2002_v55 = vpop.eup %2001  ;;  %v889_v18 = vadd.f32 1.0, %v2000_v22  ;;  %v777_v12 = vmul.f32 0.7978846, %v713_v26  ;;  %v778_v35 = vmul.f32 0.7978846, %v714_v2  ;;  %2009 = vtanh.f32 %v764_v23  ;;  %v372_v2 = vpop.f32.mrf.mxu1 }
 0x101   :  { %v2004_v56 = vpop.eup %2003  ;;  %v886_v59 = vadd.f32 1.0, %v2002_v55  ;;  %v779_v40 = vmul.f32 0.7978846, %v715_v15  ;;  %v780_v8 = vmul.f32 0.7978846, %v716_v45  ;;  %2011 = vtanh.f32 %v768_v9 }
 0x102   :  { %v2006_v52 = vpop.eup %2005  ;;  %v953_v29 = vmul.f32 0.5, %v889_v18  ;;  %v890_v58 = vadd.f32 1.0, %v2004_v56  ;;  %2013 = vtanh.f32 %v777_v12  ;;  %v525_v7 = vmul.f32 %v2840_v37, %v2840_v37 }
 0x103   :  { %v2008_v60 = vpop.eup %2007  ;;  %v950_v34 = vmul.f32 0.5, %v886_v59  ;;  %2015 = vtanh.f32 %v778_v35  ;;  %v891_v14 = vadd.f32 1.0, %v2006_v52  ;;  %v2845_v43 = vadd.f32 %v468_v57, %v2464_v19 }
 0x104   :  { %v1017_v16 = vmul.f32 %v953_v29, %v2637_v39  ;;  %v954_v50 = vmul.f32 0.5, %v890_v58  ;;  %2017 = vtanh.f32 %v779_v40  ;;  %v895_v26 = vadd.f32 1.0, %v2008_v60 }
 0x105   :  { %v1014_v23 = vmul.f32 %v950_v34, %v2601_v63  ;;  %2019 = vtanh.f32 %v780_v8  ;;  %v955_v22 = vmul.f32 0.5, %v891_v14  ;;  %v589_v15 = vmul.f32 %v525_v7, %v2840_v37 }
 0x106   :  { %v2010_v45 = vpop.eup %2009  ;;  %v1069_v9 = vpack.c.bf16 %v1017_v16, %v1013_v27  ;;  %v1018_v55 = vmul.f32 %v954_v50, %v2643_v47  ;;  %v959_v18 = vmul.f32 0.5, %v895_v26  ;;  %v526_v12 = vmul.f32 %v2845_v43, %v2845_v43 }
 0x107   :  { %v2012_v35 = vpop.eup %2011  ;;  %v1019_v39 = vmul.f32 %v955_v22, %v2646_v13  ;;  %v892_v57 = vadd.f32 1.0, %v2010_v45  ;;  %v653_v56 = vmul.f32 0.044715, %v589_v15  ;;  %v2855_v59 = vadd.f32 %v323_v10, %v2435_v5 }
 0x108   :  { %v2857_v63 = vpop.eup %2013  ;;  %1467 = vmatmul.bf16.gmra.mxu2 %v1069_v9  ;;  %v1070_v40 = vpack.c.bf16 %v1018_v55, %v1014_v23  ;;  %v1023_v27 = vmul.f32 %v959_v18, %v2687_v51  ;;  %v896_v8 = vadd.f32 1.0, %v2012_v35  ;;  %v590_v47 = vmul.f32 %v526_v12, %v2845_v43  ;;  %v421_v55 = vpop.f32.mrf.mxu2 }
 0x109   :  { %v2861_v52 = vpop.eup %2015  ;;  %v956_v29 = vmul.f32 0.5, %v892_v57  ;;  %v717_v58 = vadd.f32 %v653_v56, %v2840_v37  ;;  %v527_v13 = vmul.f32 %v2855_v59, %v2855_v59  ;;  %v2867_v7 = vadd.f32 %v372_v2, %v2437_v6  ;;  %v470_v12 = vpop.f32.mrf.mxu3 }
 0x10a   :  { %v2869_v60 = vpop.eup %2017  ;;  %1516 = vmatmul.bf16.gmra.mxu3 %v1070_v40  ;;  %v1071_v34 = vpack.c.bf16 %v1023_v27, %v1019_v39  ;;  %v960_v14 = vmul.f32 0.5, %v896_v8  ;;  %v654_v51 = vmul.f32 0.044715, %v590_v47  ;;  %v705_v10 = vadd.f32 %v2747_v20, %v2719_v48  ;;  %v326_v35 = vpop.f32.mrf.mxu0 }
 0x10b   :  { %v2873_v16 = vpop.eup %2019  ;;  %v1020_v50 = vmul.f32 %v956_v29, %v2651_v53  ;;  %v781_v26 = vmul.f32 0.7978846, %v717_v58  ;;  %v591_v23 = vmul.f32 %v527_v13, %v2855_v59  ;;  %v528_v2 = vmul.f32 %v2867_v7, %v2867_v7  ;;  %v375_v56 = vpop.f32.mrf.mxu1 }
 0x10c   :  { %1374 = vmatmul.bf16.gmra.mxu0 %v1071_v34  ;;  %v1024_v22 = vmul.f32 %v960_v14, %v2694_v61  ;;  %v718_v15 = vadd.f32 %v654_v51, %v2845_v43  ;;  %v765_v45 = vmul.f32 0.7978846, %v2707_v31  ;;  %v769_v9 = vmul.f32 0.7978846, %v705_v10 }
 0x10d   :  { %2021 = vtanh.f32 %v781_v26  ;;  %v655_v20 = vmul.f32 0.044715, %v591_v23  ;;  %v592_v18 = vmul.f32 %v528_v2, %v2867_v7  ;;  %v706_v53 = vadd.f32 %v2752_v33, %v2722_v42 }
 0x10e   :  { %v1072_v39 = vpack.c.bf16 %v1024_v22, %v1020_v50  ;;  %v782_v57 = vmul.f32 0.7978846, %v718_v15  ;;  %2023 = vtanh.f32 %v765_v45  ;;  %v766_v61 = vmul.f32 0.7978846, %v2714_v24 }
 0x10f   :  { %v719_v40 = vadd.f32 %v655_v20, %v2855_v59  ;;  %v656_v31 = vmul.f32 0.044715, %v592_v18  ;;  %2025 = vtanh.f32 %v769_v9  ;;  %v770_v27 = vmul.f32 0.7978846, %v706_v53 }
 0x110   :  { %1423 = vmatmul.bf16.gmra.mxu1 %v1072_v39  ;;  %2027 = vtanh.f32 %v782_v57  ;;  %v2888_v8 = vadd.f32 %v421_v55, %v2461_v17  ;;  %v2891_v33 = vadd.f32 %v470_v12, %v2464_v19  ;;  %v2894_v47 = vadd.f32 %v326_v35, %v2435_v5 }
 0x111   :  { %v783_v29 = vmul.f32 0.7978846, %v719_v40  ;;  %v720_v24 = vadd.f32 %v656_v31, %v2867_v7  ;;  %2029 = vtanh.f32 %v766_v61  ;;  %v2898_v58 = vadd.f32 %v375_v56, %v2437_v6 }
 0x112   :  { %2031 = vtanh.f32 %v770_v27  ;;  %v529_v13 = vmul.f32 %v2888_v8, %v2888_v8  ;;  %v530_v34 = vmul.f32 %v2891_v33, %v2891_v33  ;;  %v531_v14 = vmul.f32 %v2894_v47, %v2894_v47 }
 0x113   :  { %v2906_v51 = vpop.eup %2021  ;;  %2033 = vtanh.f32 %v783_v29  ;;  %v784_v10 = vmul.f32 0.7978846, %v720_v24  ;;  %v532_v50 = vmul.f32 %v2898_v58, %v2898_v58  ;;  %v899_v26 = vadd.f32 1.0, %v2788_v62 }
 0x114   :  { %v2024_v23 = vpop.eup %2023  ;;  %v593_v2 = vmul.f32 %v529_v13, %v2888_v8  ;;  %v594_v22 = vmul.f32 %v530_v34, %v2891_v33  ;;  %v595_v15 = vmul.f32 %v531_v14, %v2894_v47  ;;  %v903_v45 = vadd.f32 1.0, %v2827_v41 }
 0x115   :  { %v2026_v9 = vpop.eup %2025  ;;  %2035 = vtanh.f32 %v784_v10  ;;  %v893_v55 = vadd.f32 1.0, %v2024_v23  ;;  %v596_v20 = vmul.f32 %v532_v50, %v2898_v58  ;;  %v963_v62 = vmul.f32 0.5, %v899_v26 }
 0x116   :  { %v2916_v18 = vpop.eup %2027  ;;  %v897_v53 = vadd.f32 1.0, %v2026_v9  ;;  %v657_v12 = vmul.f32 0.044715, %v593_v2  ;;  %v658_v35 = vmul.f32 0.044715, %v594_v22  ;;  %v967_v40 = vmul.f32 0.5, %v903_v45 }
 0x117   :  { %v2030_v39 = vpop.eup %2029  ;;  %v957_v57 = vmul.f32 0.5, %v893_v55  ;;  %v659_v61 = vmul.f32 0.044715, %v595_v15  ;;  %v660_v56 = vmul.f32 0.044715, %v596_v20  ;;  %v424_v15 = vpop.f32.mrf.mxu2  ;;  %v1027_v20 = vmul.f32 %v963_v62, %v2725_v25 }
 0x118   :  { %v2032_v31 = vpop.eup %2031  ;;  %v961_v27 = vmul.f32 0.5, %v897_v53  ;;  %v894_v29 = vadd.f32 1.0, %v2030_v39  ;;  %v721_v41 = vadd.f32 %v657_v12, %v2888_v8  ;;  %v722_v24 = vadd.f32 %v658_v35, %v2891_v33 }
 0x119   :  { %v2920_v13 = vpop.eup %2033  ;;  %v1021_v34 = vmul.f32 %v957_v57, %v2673_v11  ;;  %v898_v14 = vadd.f32 1.0, %v2032_v31  ;;  %v723_v10 = vadd.f32 %v659_v61, %v2894_v47  ;;  %v724_v50 = vadd.f32 %v660_v56, %v2898_v58  ;;  %v473_v11 = vpop.f32.mrf.mxu3 }
 0x11a   :  { %v1025_v26 = vmul.f32 %v961_v27, %v2719_v48  ;;  %v958_v23 = vmul.f32 0.5, %v894_v29  ;;  %v785_v2 = vmul.f32 0.7978846, %v721_v41  ;;  %v786_v22 = vmul.f32 0.7978846, %v722_v24  ;;  %v328_v48 = vpop.f32.mrf.mxu0  ;;  %v377_v27 = vpop.f32.mrf.mxu1 }
 0x11b   :  { %v2926_v45 = vpop.eup %2035  ;;  %v962_v9 = vmul.f32 0.5, %v898_v14  ;;  %v787_v55 = vmul.f32 0.7978846, %v723_v10  ;;  %v1031_v53 = vmul.f32 %v967_v40, %v2761_v44  ;;  %v788_v39 = vmul.f32 0.7978846, %v724_v50 }
 0x11c   :  { %v1073_v12 = vpack.c.bf16 %v1025_v26, %v1021_v34  ;;  %v1022_v35 = vmul.f32 %v958_v23, %v2679_v46  ;;  %v900_v57 = vadd.f32 1.0, %v2792_v0  ;;  %2037 = vtanh.f32 %v785_v2 }
 0x11d   :  { %v1026_v61 = vmul.f32 %v962_v9, %v2722_v42  ;;  %v1075_v56 = vpack.c.bf16 %v1031_v53, %v1027_v20  ;;  %v904_v31 = vadd.f32 1.0, %v2831_v54  ;;  %2039 = vtanh.f32 %v786_v22 }
 0x11e   :  { %1472 = vmatmul.bf16.gmra.mxu2 %v1073_v12  ;;  %v964_v25 = vmul.f32 0.5, %v900_v57  ;;  %v2935_v44 = vadd.f32 %v424_v15, %v2461_v17  ;;  %v2938_v62 = vadd.f32 %v473_v11, %v2464_v19  ;;  %2041 = vtanh.f32 %v787_v55 }
 0x11f   :  { %v1074_v46 = vpack.c.bf16 %v1026_v61, %v1022_v35  ;;  %1379 = vmatmul.bf16.gmra.mxu0 %v1075_v56  ;;  %v968_v0 = vmul.f32 0.5, %v904_v31  ;;  %v2941_v42 = vadd.f32 %v328_v48, %v2435_v5  ;;  %v2949_v41 = vadd.f32 %v377_v27, %v2437_v6  ;;  %v426_v11 = vpop.f32.mrf.mxu2 }
 0x120   :  { %v1028_v40 = vmul.f32 %v964_v25, %v2728_v4  ;;  %v533_v54 = vmul.f32 %v2935_v44, %v2935_v44  ;;  %v534_v29 = vmul.f32 %v2938_v62, %v2938_v62  ;;  %v901_v14 = vadd.f32 1.0, %v2821_v49 }
 0x121   :  { %1521 = vmatmul.bf16.gmra.mxu3 %v1074_v46  ;;  %v1032_v24 = vmul.f32 %v968_v0, %v2772_v1  ;;  %v535_v34 = vmul.f32 %v2941_v42, %v2941_v42  ;;  %v905_v10 = vadd.f32 1.0, %v2857_v63  ;;  %v536_v26 = vmul.f32 %v2949_v41, %v2949_v41  ;;  %v475_v25 = vpop.f32.mrf.mxu3 }
 0x122   :  { %v597_v4 = vmul.f32 %v533_v54, %v2935_v44  ;;  %v598_v50 = vmul.f32 %v534_v29, %v2938_v62  ;;  %v902_v23 = vadd.f32 1.0, %v2825_v32  ;;  %v2961_v2 = vpop.eup %2037  ;;  %v965_v15 = vmul.f32 0.5, %v901_v14  ;;  %v331_v46 = vpop.f32.mrf.mxu0 }
 0x123   :  { %v1076_v22 = vpack.c.bf16 %v1032_v24, %v1028_v40  ;;  %v599_v1 = vmul.f32 %v535_v34, %v2941_v42  ;;  %v969_v9 = vmul.f32 0.5, %v905_v10  ;;  %v2964_v55 = vpop.eup %2039  ;;  %v600_v20 = vmul.f32 %v536_v26, %v2949_v41  ;;  %v380_v40 = vpop.f32.mrf.mxu1 }
 0x124   :  { %v661_v49 = vmul.f32 0.044715, %v597_v4  ;;  %v662_v63 = vmul.f32 0.044715, %v598_v50  ;;  %v906_v53 = vadd.f32 1.0, %v2861_v52  ;;  %v2968_v12 = vpop.eup %2041  ;;  %v1029_v35 = vmul.f32 %v965_v15, %v2755_v38 }
 0x125   :  { %1428 = vmatmul.bf16.gmra.mxu1 %v1076_v22  ;;  %v663_v32 = vmul.f32 0.044715, %v599_v1  ;;  %v1033_v57 = vmul.f32 %v969_v9, %v2797_v30  ;;  %v966_v48 = vmul.f32 0.5, %v902_v23  ;;  %v664_v31 = vmul.f32 0.044715, %v600_v20 }
 0x126   :  { %v725_v61 = vadd.f32 %v661_v49, %v2935_v44  ;;  %v726_v56 = vadd.f32 %v662_v63, %v2938_v62  ;;  %v970_v27 = vmul.f32 0.5, %v906_v53  ;;  %2043 = vtanh.f32 %v788_v39 }
 0x127   :  { %v727_v52 = vadd.f32 %v663_v32, %v2941_v42  ;;  %v2976_v0 = vadd.f32 %v426_v11, %v2461_v17  ;;  %v728_v38 = vadd.f32 %v664_v31, %v2949_v41  ;;  %v1077_v30 = vpack.c.bf16 %v1033_v57, %v1029_v35 }
 0x128   :  { %v789_v54 = vmul.f32 0.7978846, %v725_v61  ;;  %v1034_v29 = vmul.f32 %v970_v27, %v2800_v21  ;;  %v790_v24 = vmul.f32 0.7978846, %v726_v56  ;;  %v2983_v14 = vadd.f32 %v475_v25, %v2464_v19 }
 0x129   :  { %v537_v34 = vmul.f32 %v2976_v0, %v2976_v0  ;;  %v2986_v39 = vadd.f32 %v331_v46, %v2435_v5  ;;  %v791_v10 = vmul.f32 0.7978846, %v727_v52  ;;  %v1030_v4 = vmul.f32 %v966_v48, %v2758_v3  ;;  %v429_v48 = vpop.f32.mrf.mxu2 }
 0x12a   :  { %2045 = vtanh.f32 %v789_v54  ;;  %v2990_v50 = vadd.f32 %v380_v40, %v2437_v6  ;;  %v792_v26 = vmul.f32 0.7978846, %v728_v38  ;;  %v538_v23 = vmul.f32 %v2983_v14, %v2983_v14 }
 0x12b   :  { %v601_v21 = vmul.f32 %v537_v34, %v2976_v0  ;;  %v539_v22 = vmul.f32 %v2986_v39, %v2986_v39  ;;  %v1078_v1 = vpack.c.bf16 %v1034_v29, %v1030_v4  ;;  %v907_v9 = vadd.f32 1.0, %v2869_v60  ;;  %v333_v29 = vpop.f32.mrf.mxu0 }
 0x12c   :  { %v540_v15 = vmul.f32 %v2990_v50, %v2990_v50  ;;  %v911_v3 = vadd.f32 1.0, %v2920_v13  ;;  %v3001_v49 = vpop.eup %2043  ;;  %2047 = vtanh.f32 %v790_v24  ;;  %v602_v20 = vmul.f32 %v538_v23, %v2983_v14 }
 0x12d   :  { %v665_v63 = vmul.f32 0.044715, %v601_v21  ;;  %v603_v53 = vmul.f32 %v539_v22, %v2986_v39  ;;  %v971_v32 = vmul.f32 0.5, %v907_v9  ;;  %v908_v57 = vadd.f32 1.0, %v2873_v16 }
 0x12e   :  { %1477 = vmatmul.bf16.gmra.mxu2 %v1077_v30  ;;  %v604_v11 = vmul.f32 %v540_v15, %v2990_v50  ;;  %v975_v35 = vmul.f32 0.5, %v911_v3  ;;  %v666_v61 = vmul.f32 0.044715, %v602_v20  ;;  %v912_v56 = vadd.f32 1.0, %v2926_v45  ;;  %v478_v30 = vpop.f32.mrf.mxu3 }
 0x12f   :  { %v729_v60 = vadd.f32 %v665_v63, %v2976_v0  ;;  %v667_v13 = vmul.f32 0.044715, %v603_v53  ;;  %v1035_v25 = vmul.f32 %v971_v32, %v2803_v36  ;;  %v972_v52 = vmul.f32 0.5, %v908_v57  ;;  %v382_v36 = vpop.f32.mrf.mxu1 }
 0x130   :  { %v3009_v31 = vpop.eup %2045  ;;  %v668_v27 = vmul.f32 0.044715, %v604_v11  ;;  %v1039_v46 = vmul.f32 %v975_v35, %v2855_v59  ;;  %v730_v54 = vadd.f32 %v666_v61, %v2983_v14  ;;  %v976_v38 = vmul.f32 0.5, %v912_v56 }
 0x131   :  { %1526 = vmatmul.bf16.gmra.mxu3 %v1078_v1  ;;  %v793_v40 = vmul.f32 0.7978846, %v729_v60  ;;  %v731_v16 = vadd.f32 %v667_v13, %v2986_v39  ;;  %2049 = vtanh.f32 %v791_v10  ;;  %v3017_v34 = vadd.f32 %v429_v48, %v2461_v17  ;;  %v431_v48 = vpop.f32.mrf.mxu2 }
 0x132   :  { %v732_v45 = vadd.f32 %v668_v27, %v2990_v50  ;;  %v1079_v24 = vpack.c.bf16 %v1039_v46, %v1035_v25  ;;  %v3019_v4 = vpop.eup %2047  ;;  %2051 = vtanh.f32 %v792_v26  ;;  %v794_v59 = vmul.f32 0.7978846, %v730_v54 }
 0x133   :  { %v1036_v21 = vmul.f32 %v972_v52, %v2806_v28  ;;  %v1040_v23 = vmul.f32 %v976_v38, %v2867_v7  ;;  %2053 = vtanh.f32 %v793_v40  ;;  %v541_v10 = vmul.f32 %v3017_v34, %v3017_v34 }
 0x134   :  { %1384 = vmatmul.bf16.gmra.mxu0 %v1079_v24  ;;  %v3026_v22 = vadd.f32 %v478_v30, %v2464_v19  ;;  %v3029_v1 = vadd.f32 %v333_v29, %v2435_v5  ;;  %v795_v15 = vmul.f32 0.7978846, %v731_v16  ;;  %v3032_v26 = vadd.f32 %v382_v36, %v2437_v6 }
 0x135   :  { %v1080_v9 = vpack.c.bf16 %v1040_v23, %v1036_v21  ;;  %v909_v28 = vadd.f32 1.0, %v2906_v51  ;;  %v796_v3 = vmul.f32 0.7978846, %v732_v45  ;;  %v605_v7 = vmul.f32 %v541_v10, %v3017_v34 }
 0x136   :  { %v542_v63 = vmul.f32 %v3026_v22, %v3026_v22  ;;  %v543_v20 = vmul.f32 %v3029_v1, %v3029_v1  ;;  %2055 = vtanh.f32 %v794_v59  ;;  %v544_v5 = vmul.f32 %v3032_v26, %v3032_v26  ;;  %v480_v30 = vpop.f32.mrf.mxu3 }
 0x137   :  { %1433 = vmatmul.bf16.gmra.mxu1 %v1080_v9  ;;  %v913_v53 = vadd.f32 1.0, %v2961_v2  ;;  %v973_v6 = vmul.f32 0.5, %v909_v28  ;;  %v2050_v11 = vpop.eup %2049  ;;  %v669_v32 = vmul.f32 0.044715, %v605_v7  ;;  %v910_v57 = vadd.f32 1.0, %v2916_v18 }
 0x138   :  { %v606_v51 = vmul.f32 %v542_v63, %v3026_v22  ;;  %v607_v35 = vmul.f32 %v543_v20, %v3029_v1  ;;  %v2052_v60 = vpop.eup %2051  ;;  %v608_v61 = vmul.f32 %v544_v5, %v3032_v26  ;;  %v914_v27 = vadd.f32 1.0, %v2964_v55 }
 0x139   :  { %v977_v13 = vmul.f32 0.5, %v913_v53  ;;  %v1037_v56 = vmul.f32 %v973_v6, %v2840_v37  ;;  %v2054_v25 = vpop.eup %2053  ;;  %v733_v2 = vadd.f32 %v669_v32, %v3017_v34  ;;  %v974_v40 = vmul.f32 0.5, %v910_v57 }
 0x13a   :  { %v670_v46 = vmul.f32 0.044715, %v606_v51  ;;  %v671_v52 = vmul.f32 0.044715, %v607_v35  ;;  %v672_v54 = vmul.f32 0.044715, %v608_v61  ;;  %v3052_v18 = vadd.f32 %v431_v48, %v2461_v17 }
 0x13b   :  { %v1041_v16 = vmul.f32 %v977_v13, %v2888_v8  ;;  %v978_v38 = vmul.f32 0.5, %v914_v27  ;;  %2057 = vtanh.f32 %v795_v15  ;;  %v1038_v55 = vmul.f32 %v974_v40, %v2845_v43 }
 0x13c   :  { %v734_v29 = vadd.f32 %v670_v46, %v3026_v22  ;;  %v735_v37 = vadd.f32 %v671_v52, %v3029_v1  ;;  %v2056_v45 = vpop.eup %2055  ;;  %v736_v24 = vadd.f32 %v672_v54, %v3032_v26  ;;  %v545_v8 = vmul.f32 %v3052_v18, %v3052_v18 }
 0x13d   :  { %v1081_v36 = vpack.c.bf16 %v1041_v16, %v1037_v56  ;;  %v1042_v59 = vmul.f32 %v978_v38, %v2891_v33  ;;  %2059 = vtanh.f32 %v796_v3  ;;  %v797_v17 = vmul.f32 0.7978846, %v733_v2 }
 0x13e   :  { %v799_v21 = vmul.f32 0.7978846, %v735_v37  ;;  %v3062_v23 = vadd.f32 %v480_v30, %v2464_v19  ;;  %v800_v10 = vmul.f32 0.7978846, %v736_v24  ;;  %v609_v43 = vmul.f32 %v545_v8, %v3052_v18 }
 0x13f   :  { %1482 = vmatmul.bf16.gmra.mxu2 %v1081_v36  ;;  %v1082_v15 = vpack.c.bf16 %v1042_v59, %v1038_v55  ;;  %v915_v9 = vadd.f32 1.0, %v2968_v12  ;;  %v798_v28 = vmul.f32 0.7978846, %v734_v29  ;;  %v919_v7 = vadd.f32 1.0, %v2050_v11 }
 0x140   :  { %v546_v33 = vmul.f32 %v3062_v23, %v3062_v23  ;;  %v916_v63 = vadd.f32 1.0, %v3001_v49  ;;  %2061 = vtanh.f32 %v799_v21  ;;  %v673_v3 = vmul.f32 0.044715, %v609_v43 }
 0x141   :  { %1531 = vmatmul.bf16.gmra.mxu3 %v1082_v15  ;;  %v979_v20 = vmul.f32 0.5, %v915_v9  ;;  %v920_v19 = vadd.f32 1.0, %v2052_v60  ;;  %v2058_v5 = vpop.eup %2057  ;;  %2063 = vtanh.f32 %v800_v10  ;;  %v983_v6 = vmul.f32 0.5, %v919_v7 }
 0x142   :  { %v610_v53 = vmul.f32 %v546_v33, %v3062_v23  ;;  %v980_v32 = vmul.f32 0.5, %v916_v63  ;;  %v737_v12 = vadd.f32 %v673_v3, %v3052_v18  ;;  %v917_v11 = vadd.f32 1.0, %v3009_v31  ;;  %v1360_v13 = vpop.f32.mrf.mxu0 }
 0x143   :  { %v1043_v51 = vmul.f32 %v979_v20, %v2894_v47  ;;  %v984_v35 = vmul.f32 0.5, %v920_v19  ;;  %v2060_v57 = vpop.eup %2059  ;;  %v1047_v48 = vmul.f32 %v983_v6, %v2941_v42  ;;  %v921_v60 = vadd.f32 1.0, %v2054_v25  ;;  %v1409_v24 = vpop.f32.mrf.mxu1 }
 0x144   :  { %v674_v49 = vmul.f32 0.044715, %v610_v53  ;;  %v1044_v61 = vmul.f32 %v980_v32, %v2898_v58  ;;  %v801_v56 = vmul.f32 0.7978846, %v737_v12  ;;  %v981_v2 = vmul.f32 0.5, %v917_v11 }
 0x145   :  { %v1048_v27 = vmul.f32 %v984_v35, %v2949_v41  ;;  %v918_v46 = vadd.f32 1.0, %v3019_v4  ;;  %v1083_v47 = vpack.c.bf16 %v1047_v48, %v1043_v51  ;;  %v985_v40 = vmul.f32 0.5, %v921_v60  ;;  %v3082_v41 = vld [vmem:[%s3118_s4] ss:$0 sm:$0xff]  ;;  %s2099_s4 = smov [#allocation2]  }
 0x146   :  { %v738_v52 = vadd.f32 %v674_v49, %v3062_v23  ;;  %v922_v54 = vadd.f32 1.0, %v2056_v45  ;;  %v2062_v31 = vpop.eup %2061  ;;  %2065 = vtanh.f32 %v801_v56  ;;  %v1045_v4 = vmul.f32 %v981_v2, %v2935_v44  ;;  %s1567_s23 = sshll.u32 %s2099_s4, 4  ;;  %s1568_s23 = int_to_ptr.vmem [resolvable:$true] %s1567_s23 }
 0x147   :  { %v1084_v16 = vpack.c.bf16 %v1048_v27, %v1044_v61  ;;  %v982_v38 = vmul.f32 0.5, %v918_v46  ;;  %v2064_v42 = vpop.eup %2063  ;;  %2067 = vtanh.f32 %v797_v17  ;;  %1389 = vmatmul.bf16.gmra.mxu0 %v1083_v47  ;;  %v1049_v25 = vmul.f32 %v985_v40, %v2976_v0 }
 0x148   :  { %v802_v58 = vmul.f32 0.7978846, %v738_v52  ;;  %v986_v30 = vmul.f32 0.5, %v922_v54  ;;  %2069 = vtanh.f32 %v798_v28  ;;  %v927_v29 = vadd.f32 1.0, %v2062_v31 }
 0x149   :  { %1438 = vmatmul.bf16.gmra.mxu1 %v1084_v16  ;;  %v928_v37 = vadd.f32 1.0, %v2064_v42  ;;  %v923_v45 = vadd.f32 1.0, %v2058_v5  ;;  %v1085_v36 = vpack.c.bf16 %v1049_v25, %v1045_v4  ;;  %v1046_v0 = vmul.f32 %v982_v38, %v2938_v62 }
 0x14a   :  { %2071 = vtanh.f32 %v802_v58  ;;  %v1050_v55 = vmul.f32 %v986_v30, %v2983_v14  ;;  %v924_v59 = vadd.f32 1.0, %v2060_v57  ;;  %v991_v8 = vmul.f32 0.5, %v927_v29  ;;  %v1362_v28 = vpop.f32.mrf.mxu0 }
 0x14b   :  { %v1361_v17 = vadd.f32 %v3082_v41, %v1360_v13  ;;  %v992_v15 = vmul.f32 0.5, %v928_v37  ;;  %v987_v9 = vmul.f32 0.5, %v923_v45  ;;  %v1363_v6 = vadd.f32 %v3082_v41, %v1362_v28  ;;  %v1411_v48 = vpop.f32.mrf.mxu1 }
 0x14c   :  { %v2066_v21 = vpop.eup %2065  ;;  %v1086_v10 = vpack.c.bf16 %v1050_v55, %v1046_v0  ;;  %v988_v14 = vmul.f32 0.5, %v924_v59  ;;  %v1055_v20 = vmul.f32 %v991_v8, %v3029_v1 }
 0x14d   :  { %v2068_v43 = vpop.eup %2067  ;;  %v1410_v44 = vadd.f32 %v1409_v24, %v1361_v17  ;;  %v929_v63 = vadd.f32 1.0, %v2066_v21  ;;  %v1056_v19 = vmul.f32 %v992_v15, %v3032_v26  ;;  %v1051_v12 = vmul.f32 %v987_v9, %v2986_v39 }
 0x14e   :  { %v1458_v33 = vpop.f32.mrf.mxu2  ;;  %v2070_v7 = vpop.eup %2069  ;;  %v925_v5 = vadd.f32 1.0, %v2068_v43  ;;  %v1052_v35 = vmul.f32 %v988_v14, %v2990_v50  ;;  %v1412_v13 = vadd.f32 %v1411_v48, %v1363_v6 }
 0x14f   :  { %1487 = vmatmul.bf16.gmra.mxu2 %v1085_v36  ;;  %v1459_v62 = vadd.f32 %v1458_v33, %v1410_v44  ;;  %v993_v11 = vmul.f32 0.5, %v929_v63  ;;  %v926_v57 = vadd.f32 1.0, %v2070_v7  ;;  %v1087_v49 = vpack.c.bf16 %v1055_v20, %v1051_v12 }
 0x150   :  { %v2072_v3 = vpop.eup %2071  ;;  %v1088_v1 = vpack.c.bf16 %v1056_v19, %v1052_v35  ;;  %v989_v61 = vmul.f32 0.5, %v925_v5 }
 0x151   :  { %1536 = vmatmul.bf16.gmra.mxu3 %v1086_v10  ;;  %v930_v53 = vadd.f32 1.0, %v2072_v3  ;;  %v1507_v32 = vpop.f32.mrf.mxu3  ;;  %v1057_v56 = vmul.f32 %v993_v11, %v3052_v18  ;;  %v990_v27 = vmul.f32 0.5, %v926_v57 }
 0x152   :  { %v1508_v51 = vadd.f32 %v1507_v32, %v1459_v62  ;;  %v1053_v39 = vmul.f32 %v989_v61, %v3017_v34 }
 0x153   :  { %v994_v60 = vmul.f32 0.5, %v930_v53  ;;  %v1054_v40 = vmul.f32 %v990_v27, %v3026_v22 }
 0x154   :  { %1547 = vst [vmem:[#allocation2] sm:$0xff] %v1508_v51  ;;  %v1089_v47 = vpack.c.bf16 %v1057_v56, %v1053_v39 }
 0x155   :  { %v1058_v50 = vmul.f32 %v994_v60, %v3062_v23 }
 0x156   :  { %v1460_v26 = vpop.f32.mrf.mxu2 }
 0x157   :  { %v1461_v2 = vadd.f32 %v1460_v26, %v1412_v13  ;;  %1394 = vmatmul.bf16.gmra.mxu0 %v1087_v49  ;;  %v1090_v54 = vpack.c.bf16 %v1058_v50, %v1054_v40 }
 0x159   :  { %1443 = vmatmul.bf16.gmra.mxu1 %v1088_v1  ;;  %v1509_v46 = vpop.f32.mrf.mxu3  ;;  %v1365_v31 = vpop.f32.mrf.mxu0 }
 0x15a   :  { %v1510_v52 = vadd.f32 %v1509_v46, %v1461_v2  ;;  %v1366_v18 = vadd.f32 %v3082_v41, %v1365_v31 }
 0x15c   :  { %1548 = vst [vmem:[#allocation2 + $0x8] sm:$0xff] %v1510_v52  ;;  %v1414_v16 = vpop.f32.mrf.mxu1 }
 0x15d   :  { %v1415_v42 = vadd.f32 %v1414_v16, %v1366_v18 }
 0x15f   :  { %1492 = vmatmul.bf16.gmra.mxu2 %v1089_v47 }
 0x161   :  { %1541 = vmatmul.bf16.gmra.mxu3 %v1090_v54  ;;  %v1367_v58 = vpop.f32.mrf.mxu0 }
 0x162   :  { %v1368_v34 = vadd.f32 %v3082_v41, %v1367_v58 }
 0x164   :  { %v1416_v30 = vpop.f32.mrf.mxu1 }
 0x165   :  { %v1417_v37 = vadd.f32 %v1416_v30, %v1368_v34 }
 0x167   :  { %v1463_v38 = vpop.f32.mrf.mxu2 }
 0x168   :  { %v1464_v25 = vadd.f32 %v1463_v38, %v1415_v42 }
 0x16f   :  { %v1512_v23 = vpop.f32.mrf.mxu3  ;;  %v1465_v29 = vpop.f32.mrf.mxu2 }
 0x170   :  { %v1513_v4 = vadd.f32 %v1512_v23, %v1464_v25  ;;  %v1466_v22 = vadd.f32 %v1465_v29, %v1417_v37 }
 0x172   :  { %1549 = vst [vmem:[#allocation2 + $0x10] sm:$0xff] %v1513_v4 }
 0x173   :  { %v1370_v55 = vpop.f32.mrf.mxu0 }
 0x174   :  { %v1371_v8 = vadd.f32 %v3082_v41, %v1370_v55 }
 0x176   :  { %v1419_v36 = vpop.f32.mrf.mxu1 }
 0x177   :  { %v1514_v45 = vpop.f32.mrf.mxu3  ;;  %v1420_v21 = vadd.f32 %v1419_v36, %v1371_v8 }
 0x178   :  { %v1515_v24 = vadd.f32 %v1514_v45, %v1466_v22 }
 0x17a   :  { %1550 = vst [vmem:[#allocation2 + $0x18] sm:$0xff] %v1515_v24 }
 0x17b   :  { %v1372_v0 = vpop.f32.mrf.mxu0 }
 0x17c   :  { %v1373_v9 = vadd.f32 %v3082_v41, %v1372_v0 }
 0x17e   :  { %v1421_v59 = vpop.f32.mrf.mxu1 }
 0x17f   :  { %v1422_v33 = vadd.f32 %v1421_v59, %v1373_v9 }
 0x189   :  { %v1375_v17 = vpop.f32.mrf.mxu0 }
 0x18a   :  { %v1376_v19 = vadd.f32 %v3082_v41, %v1375_v17 }
 0x18b   :  { %v1468_v10 = vpop.f32.mrf.mxu2 }
 0x18c   :  { %v1469_v15 = vadd.f32 %v1468_v10, %v1420_v21 }
 0x18d   :  { %v1517_v43 = vpop.f32.mrf.mxu3  ;;  %v1424_v28 = vpop.f32.mrf.mxu1 }
 0x18e   :  { %v1518_v44 = vadd.f32 %v1517_v43, %v1469_v15  ;;  %v1425_v53 = vadd.f32 %v1424_v28, %v1376_v19 }
 0x190   :  { %1551 = vst [vmem:[#allocation2 + $0x20] sm:$0xff] %v1518_v44 }
 0x191   :  { %v1377_v14 = vpop.f32.mrf.mxu0 }
 0x192   :  { %v1378_v51 = vadd.f32 %v3082_v41, %v1377_v14 }
 0x193   :  { %v1470_v7 = vpop.f32.mrf.mxu2 }
 0x194   :  { %v1471_v63 = vadd.f32 %v1470_v7, %v1422_v33 }
 0x195   :  { %v1519_v3 = vpop.f32.mrf.mxu3  ;;  %v1426_v62 = vpop.f32.mrf.mxu1 }
 0x196   :  { %v1520_v20 = vadd.f32 %v1519_v3, %v1471_v63  ;;  %v1427_v49 = vadd.f32 %v1426_v62, %v1378_v51 }
 0x198   :  { %1552 = vst [vmem:[#allocation2 + $0x28] sm:$0xff] %v1520_v20 }
 0x19c   :  { %v1380_v5 = vpop.f32.mrf.mxu0 }
 0x19d   :  { %v1381_v61 = vadd.f32 %v3082_v41, %v1380_v5 }
 0x1a1   :  { %v1473_v6 = vpop.f32.mrf.mxu2 }
 0x1a2   :  { %v1474_v32 = vadd.f32 %v1473_v6, %v1425_v53  ;;  %v1429_v12 = vpop.f32.mrf.mxu1 }
 0x1a3   :  { %v1430_v56 = vadd.f32 %v1429_v12, %v1381_v61 }
 0x1a4   :  { %v1522_v35 = vpop.f32.mrf.mxu3  ;;  %v1382_v57 = vpop.f32.mrf.mxu0 }
 0x1a5   :  { %v1523_v11 = vadd.f32 %v1522_v35, %v1474_v32  ;;  %v1383_v50 = vadd.f32 %v3082_v41, %v1382_v57 }
 0x1a7   :  { %1553 = vst [vmem:[#allocation2 + $0x30] sm:$0xff] %v1523_v11 }
 0x1a9   :  { %v1475_v48 = vpop.f32.mrf.mxu2 }
 0x1aa   :  { %v1476_v1 = vadd.f32 %v1475_v48, %v1427_v49  ;;  %v1431_v13 = vpop.f32.mrf.mxu1 }
 0x1ab   :  { %v1432_v40 = vadd.f32 %v1431_v13, %v1383_v50 }
 0x1ac   :  { %v1524_v60 = vpop.f32.mrf.mxu3 }
 0x1ad   :  { %v1525_v26 = vadd.f32 %v1524_v60, %v1476_v1 }
 0x1af   :  { %1554 = vst [vmem:[#allocation2 + $0x38] sm:$0xff] %v1525_v26 }
 0x1b1   :  { %v1478_v27 = vpop.f32.mrf.mxu2  ;;  %v1385_v2 = vpop.f32.mrf.mxu0 }
 0x1b2   :  { %v1479_v39 = vadd.f32 %v1478_v27, %v1430_v56  ;;  %v1386_v38 = vadd.f32 %v3082_v41, %v1385_v2 }
 0x1b4   :  { %v1527_v46 = vpop.f32.mrf.mxu3  ;;  %v1434_v47 = vpop.f32.mrf.mxu1 }
 0x1b5   :  { %v1528_v52 = vadd.f32 %v1527_v46, %v1479_v39  ;;  %v1435_v25 = vadd.f32 %v1434_v47, %v1386_v38 }
 0x1b7   :  { %1555 = vst [vmem:[#allocation2 + $0x40] sm:$0xff] %v1528_v52 }
 0x1b9   :  { %v1480_v54 = vpop.f32.mrf.mxu2  ;;  %v1387_v18 = vpop.f32.mrf.mxu0 }
 0x1ba   :  { %v1481_v31 = vadd.f32 %v1480_v54, %v1432_v40  ;;  %v1388_v4 = vadd.f32 %v3082_v41, %v1387_v18 }
 0x1bc   :  { %v1529_v16 = vpop.f32.mrf.mxu3  ;;  %v1436_v58 = vpop.f32.mrf.mxu1 }
 0x1bd   :  { %v1530_v42 = vadd.f32 %v1529_v16, %v1481_v31  ;;  %v1437_v22 = vadd.f32 %v1436_v58, %v1388_v4 }
 0x1bf   :  { %1556 = vst [vmem:[#allocation2 + $0x48] sm:$0xff] %v1530_v42 }
 0x1c2   :  { %v1483_v34 = vpop.f32.mrf.mxu2 }
 0x1c3   :  { %v1484_v23 = vadd.f32 %v1483_v34, %v1435_v25 }
 0x1c4   :  { %v1532_v30 = vpop.f32.mrf.mxu3  ;;  %v1390_v37 = vpop.f32.mrf.mxu0 }
 0x1c5   :  { %v1533_v29 = vadd.f32 %v1532_v30, %v1484_v23  ;;  %v1391_v0 = vadd.f32 %v3082_v41, %v1390_v37 }
 0x1c6   :  { %v1439_v55 = vpop.f32.mrf.mxu1 }
 0x1c7   :  { %1557 = vst [vmem:[#allocation2 + $0x50] sm:$0xff] %v1533_v29  ;;  %v1440_v17 = vadd.f32 %v1439_v55, %v1391_v0 }
 0x1ca   :  { %v1485_v45 = vpop.f32.mrf.mxu2 }
 0x1cb   :  { %v1486_v24 = vadd.f32 %v1485_v45, %v1437_v22 }
 0x1cc   :  { %v1534_v36 = vpop.f32.mrf.mxu3  ;;  %v1392_v8 = vpop.f32.mrf.mxu0 }
 0x1cd   :  { %v1535_v59 = vadd.f32 %v1534_v36, %v1486_v24  ;;  %v1393_v9 = vadd.f32 %v3082_v41, %v1392_v8 }
 0x1ce   :  { %v1441_v15 = vpop.f32.mrf.mxu1 }
 0x1cf   :  { %1558 = vst [vmem:[#allocation2 + $0x58] sm:$0xff] %v1535_v59  ;;  %v1442_v33 = vadd.f32 %v1441_v15, %v1393_v9 }
 0x1d2   :  { %v1488_v21 = vpop.f32.mrf.mxu2 }
 0x1d3   :  { %v1489_v10 = vadd.f32 %v1488_v21, %v1440_v17 }
 0x1d4   :  { %v1537_v43 = vpop.f32.mrf.mxu3  ;;  %v1395_v28 = vpop.f32.mrf.mxu0 }
 0x1d5   :  { %v1538_v44 = vadd.f32 %v1537_v43, %v1489_v10  ;;  %v1396_v3 = vadd.f32 %v3082_v41, %v1395_v28 }
 0x1d6   :  { %v1444_v62 = vpop.f32.mrf.mxu1 }
 0x1d7   :  { %1559 = vst [vmem:[#allocation2 + $0x60] sm:$0xff] %v1538_v44  ;;  %v1445_v19 = vadd.f32 %v1444_v62, %v1396_v3 }
 0x1da   :  { %v1490_v7 = vpop.f32.mrf.mxu2 }
 0x1db   :  { %v1491_v14 = vadd.f32 %v1490_v7, %v1442_v33 }
 0x1dc   :  { %v1539_v63 = vpop.f32.mrf.mxu3  ;;  %v1397_v5 = vpop.f32.mrf.mxu0 }
 0x1dd   :  { %v1540_v20 = vadd.f32 %v1539_v63, %v1491_v14  ;;  %v1398_v12 = vadd.f32 %v3082_v41, %v1397_v5 }
 0x1de   :  { %v1446_v35 = vpop.f32.mrf.mxu1 }
 0x1df   :  { %1560 = vst [vmem:[#allocation2 + $0x68] sm:$0xff] %v1540_v20  ;;  %v1447_v11 = vadd.f32 %v1446_v35, %v1398_v12 }
 0x1e2   :  { %v1493_v53 = vpop.f32.mrf.mxu2 }
 0x1e3   :  { %v1494_v6 = vadd.f32 %v1493_v53, %v1445_v19 }
 0x1e4   :  { %v1542_v32 = vpop.f32.mrf.mxu3 }
 0x1e5   :  { %v1543_v51 = vadd.f32 %v1542_v32, %v1494_v6 }
 0x1e7   :  { %1561 = vst [vmem:[#allocation2 + $0x70] sm:$0xff] %v1543_v51 }
 0x1ea   :  { %v1495_v57 = vpop.f32.mrf.mxu2 }
 0x1eb   :  { %v1496_v49 = vadd.f32 %v1495_v57, %v1447_v11 }
 0x1ec   :  { %v1544_v48 = vpop.f32.mrf.mxu3 }
 0x1ed   :  { %v1545_v1 = vadd.f32 %v1544_v48, %v1496_v49 }
 0x1ef   :  { %1562 = vst [vmem:[#allocation2 + $0x78] sm:$0xff] %v1545_v1 }
 0x1f0   :  { %1575 = dma.vmem_to_hbm [thread:$0]  %s1568_s23, 2048, %s1570_s26, [#allocation3], %s2100_s27, %s2100_s27, %s2101_s28  }
 0x1f1   :  { %2097 = dma.done.wait [#allocation3], 2048  }
 0x1f2   :  { %2098 = vsyncadd [#allocation3], 4294965248 }
 0x1f3   :  { %1580 = vsyncpa [#allocation3], 1 }

</bundles_post_ra>
